<compile_context>
chip_gen: v6e
topology: v6e:2x2x1
jax: 0.10.0
libtpu: 0.0.40
codegen_flags: <defaults>
</compile_context>

<pallas_src>
import jax
import jax.numpy as jnp
from jax.experimental import pallas as pl
from jax.experimental.pallas import tpu as pltpu

# ---------------------------------------------------------------------------
# Problem sizes (small, consistent with the module's forward)
# ---------------------------------------------------------------------------
N, C_IN, H, W = 2, 4, 8, 8          # input batch, channels, spatial
C_MID = 8                           # conv output channels of the truncated base
K = 3                               # conv kernel size (padding=1, stride=1)
HW = H * W
D = C_MID * HW                      # flattened feature dim = 512
P = 16                              # number of u_vectors (sign patterns)
NUM_CLASSES = 10


# ---------------------------------------------------------------------------
# Fused kernel: conv3x3+ReLU (as matmul)  ->  sign patterns  ->  gated convex head
#   w_ref: [C_MID, C_IN*K*K + 1]   conv weight with the bias folded in as last column
#   p_ref: [N, C_IN*K*K + 1, HW]   per-sample im2col patches with a ones row appended
#   u_ref: [C_MID, HW, P]          u_vectors regrouped per conv channel
#   v_ref: [C_MID, HW, P*CLS]      cvx V weights regrouped per conv channel (lane dense)
#   r_ref: [P, P*CLS]              0/1 gate-expansion matrix   (R[p, p*CLS+c] = 1)
#   s_ref: [P*CLS, CLS]            0/1 per-class block-sum     (S[p*CLS+c, c'] = (c==c'))
#   o_ref: [N, CLS]
# ---------------------------------------------------------------------------
def _spliced_fused_kernel(w_ref, p_ref, u_ref, v_ref, r_ref, s_ref, o_ref):
    n_batch = p_ref.shape[0]
    c_mid = w_ref.shape[0]
    n_pat = u_ref.shape[2]
    pc = v_ref.shape[2]

    w = w_ref[...]                                   # [C_MID, KK1]
    r = r_ref[...]                                   # [P, P*CLS]
    s = s_ref[...]                                   # [P*CLS, CLS]

    for n in range(n_batch):                         # static unroll (N = 2)
        # base.truncated_forward: conv3x3(pad=1) + bias + ReLU for sample n,
        # output channels in sublanes, pixels in lanes: [C_MID, HW].
        conv_n = jnp.maximum(
            jnp.dot(w, p_ref[n], preferred_element_type=jnp.float32), 0.0)

        # Head contraction over D = (channel, pixel), split per channel so the
        # conv activation never needs a cross lane/sublane relayout:
        #   z[p]  = sum_c conv_n[c,:] @ u[c,:,p]        (= feat @ u_vectors)
        #   pv[q] = sum_c conv_n[c,:] @ V[c,:,q]        (= feat @ V, q = (pattern,class))
        z = jnp.zeros((1, n_pat), jnp.float32)
        pv = jnp.zeros((1, pc), jnp.float32)
        for c in range(c_mid):                       # static unroll (C_MID = 8)
            row = conv_n[c:c + 1, :]                                       # [1, HW]
            z = z + jnp.dot(row, u_ref[c], preferred_element_type=jnp.float32)
            pv = pv + jnp.dot(row, v_ref[c], preferred_element_type=jnp.float32)

        gate = (z >= 0.0).astype(jnp.float32)                              # [1, P]
        gate_exp = jnp.dot(gate, r, preferred_element_type=jnp.float32)    # [1, P*CLS]
        out_n = jnp.dot(gate_exp * pv, s, preferred_element_type=jnp.float32)  # [1, CLS]
        o_ref[pl.ds(n, 1), :] = out_n.astype(o_ref.dtype)


def _spliced_pallas(w_aug, patches, u3, v3, r_expand, s_sum):
    n, kk1, hw = patches.shape
    c_mid = w_aug.shape[0]
    p = u3.shape[2]
    pc = v3.shape[2]
    n_cls = s_sum.shape[1]
    d = c_mid * hw
    flops = 2 * n * (c_mid * kk1 * hw + d * p + d * pc + p * pc + pc * n_cls)
    bytes_accessed = 4 * (c_mid * kk1 + n * kk1 * hw + d * p + d * pc
                          + p * pc + pc * n_cls + n * n_cls)
    return pl.pallas_call(
        _spliced_fused_kernel,
        out_shape=jax.ShapeDtypeStruct((n, n_cls), jnp.float32),
        in_specs=[pl.BlockSpec(memory_space=pltpu.MemorySpace.VMEM)] * 6,
        out_specs=pl.BlockSpec(memory_space=pltpu.MemorySpace.VMEM),
        cost_estimate=pl.CostEstimate(
            flops=flops, transcendentals=0, bytes_accessed=bytes_accessed),
    )(w_aug, patches, u3, v3, r_expand, s_sum)


# ---------------------------------------------------------------------------
# Plain-JAX glue: per-sample im2col, weight/bias augmentation, per-channel u/V views,
# constant gate matrices (data-independent -> folded at compile time inside jit)
# ---------------------------------------------------------------------------
def im2col_batched(x, k=3, pad=1):
    """patches [N, C_in*K*K, H*W]; rows ordered (ci, ki, kj) to match conv_w.reshape."""
    n, c, h, w = x.shape
    xp = jnp.pad(x, ((0, 0), (0, 0), (pad, pad), (pad, pad)))
    cols = []
    for di in range(k):
        for dj in range(k):
            cols.append(xp[:, :, di:di + h, dj:dj + w])       # [n, c, h, w]
    pt = jnp.stack(cols, axis=2)                               # [n, c, k*k, h, w]
    return pt.reshape(n, c * k * k, h * w)


@jax.jit
def spliced_forward(x, conv_w, conv_b, u_vectors, v_weights):
    n, c_in, h, w = x.shape
    c_mid = conv_w.shape[0]
    p, d, n_cls = v_weights.shape
    hw = h * w

    # --- base.truncated_forward inputs: im2col patches + ones row, weight + bias col ---
    patches = im2col_batched(x, k=K, pad=1)                                # [n, c_in*9, hw]
    patches = jnp.concatenate(
        [patches, jnp.ones((n, 1, hw), patches.dtype)], axis=1)           # [n, c_in*9+1, hw]
    w_aug = jnp.concatenate(
        [conv_w.reshape(c_mid, c_in * K * K), conv_b[:, None]], axis=1)   # [c_mid, c_in*9+1]

    # --- per-conv-channel views of u and V (D ordered (channel, pixel) = NCHW flatten) ---
    u3 = u_vectors.reshape(c_mid, hw, p)                                   # [c_mid, hw, P]
    v3 = v_weights.transpose(1, 0, 2).reshape(c_mid, hw, p * n_cls)        # [c_mid, hw, P*CLS]

    # --- constant 0/1 matrices for gate expansion and per-pattern sum ---
    r_expand = jnp.kron(jnp.eye(p, dtype=jnp.float32),
                        jnp.ones((1, n_cls), jnp.float32))                 # [P, P*CLS]
    s_sum = jnp.kron(jnp.ones((p, 1), jnp.float32),
                     jnp.eye(n_cls, dtype=jnp.float32))                    # [P*CLS, CLS]

    return _spliced_pallas(w_aug, patches, u3, v3, r_expand, s_sum)        # [n, CLS]


# ---------------------------------------------------------------------------
# Pure-JAX reference (independent path: XLA conv) for validation
# ---------------------------------------------------------------------------
def reference_forward(x, conv_w, conv_b, u_vectors, v_weights):
    hi = jax.lax.Precision.HIGHEST
    conv = jax.lax.conv_general_dilated(
        x, conv_w, window_strides=(1, 1), padding="SAME",
        dimension_numbers=("NCHW", "OIHW", "NCHW"), precision=hi)
    conv = jnp.maximum(conv + conv_b[None, :, None, None], 0.0)
    feat = conv.reshape(x.shape[0], -1)                                    # NCHW flatten
    z = jnp.dot(feat, u_vectors, precision=hi)
    pattern = (z >= 0.0).astype(jnp.float32)
    return jnp.einsum("np,nd,pdc->nc", pattern, feat, v_weights, precision=hi)


# ---------------------------------------------------------------------------
if __name__ == "__main__":
    key = jax.random.PRNGKey(0)
    kx, kw, kb, ku, kv = jax.random.split(key, 5)

    x = jax.random.normal(kx, (N, C_IN, H, W), dtype=jnp.float32)
    conv_w = jax.random.normal(kw, (C_MID, C_IN, K, K), dtype=jnp.float32) * 0.1
    conv_b = jax.random.normal(kb, (C_MID,), dtype=jnp.float32) * 0.1
    u_vectors = jax.random.normal(ku, (D, P), dtype=jnp.float32)           # .float() in module
    v_weights = jax.random.normal(kv, (P, D, NUM_CLASSES), dtype=jnp.float32) * 0.05

    out = jax.block_until_ready(spliced_forward(x, conv_w, conv_b, u_vectors, v_weights))

    assert out.shape == (N, NUM_CLASSES), out.shape
    assert out.dtype == jnp.float32
    assert bool(jnp.all(jnp.isfinite(out)))

    ref = jax.block_until_ready(reference_forward(x, conv_w, conv_b, u_vectors, v_weights))
    assert bool(jnp.allclose(out, ref, rtol=2e-2, atol=2e-2)), (out, ref)

    print("KERNEL_OK")
</pallas_src>

<mosaic_0001>
module attributes {stable_mosaic.version = 11 : i64} {
  func.func @_spliced_fused_kernel(%arg0: memref<8x37xf32, #tpu.memory_space<vmem>>, %arg1: memref<2x37x64xf32, #tpu.memory_space<vmem>>, %arg2: memref<8x64x16xf32, #tpu.memory_space<vmem>>, %arg3: memref<8x64x160xf32, #tpu.memory_space<vmem>>, %arg4: memref<16x160xf32, #tpu.memory_space<vmem>>, %arg5: memref<160x10xf32, #tpu.memory_space<vmem>>, %arg6: memref<2x10xf32, #tpu.memory_space<vmem>>) attributes {dimension_semantics = [], scalar_prefetch = 0 : i64, scratch_operands = 0 : i64, tpu.core_type = #tpu.core_type<tc>} {
    %c0 = arith.constant 0 : index
    %c0_0 = arith.constant 0 : index
    %0 = vector.load %arg0[%c0, %c0_0] : memref<8x37xf32, #tpu.memory_space<vmem>>, vector<8x37xf32>
    %c0_1 = arith.constant 0 : index
    %c0_2 = arith.constant 0 : index
    %1 = vector.load %arg4[%c0_1, %c0_2] : memref<16x160xf32, #tpu.memory_space<vmem>>, vector<16x160xf32>
    %c0_3 = arith.constant 0 : index
    %c0_4 = arith.constant 0 : index
    %2 = vector.load %arg5[%c0_3, %c0_4] : memref<160x10xf32, #tpu.memory_space<vmem>>, vector<160x10xf32>
    %c0_5 = arith.constant 0 : index
    %c0_6 = arith.constant 0 : index
    %c0_7 = arith.constant 0 : index
    %3 = vector.load %arg1[%c0_5, %c0_6, %c0_7] : memref<2x37x64xf32, #tpu.memory_space<vmem>>, vector<1x37x64xf32>
    %4 = vector.shape_cast %3 : vector<1x37x64xf32> to vector<37x64xf32>
    %cst = arith.constant dense<0.000000e+00> : vector<8x64xf32>
    %5 = tpu.matmul %0, %4, %cst {dimension_numbers = #tpu.dot_dimension_numbers<[1], [0], [0], [1], [0, 0, 1, 1], [], []>} : vector<8x37xf32>, vector<37x64xf32>, vector<8x64xf32> -> vector<8x64xf32>
    %cst_8 = arith.constant 0.000000e+00 : f32
    %6 = vector.broadcast %cst_8 : f32 to vector<8x64xf32>
    %7 = arith.maximumf %5, %6 : vector<8x64xf32>
    %cst_9 = arith.constant 0.000000e+00 : f32
    %8 = vector.broadcast %cst_9 : f32 to vector<1x16xf32>
    %cst_10 = arith.constant 0.000000e+00 : f32
    %9 = vector.broadcast %cst_10 : f32 to vector<1x160xf32>
    %10 = vector.extract_strided_slice %7 {offsets = [0, 0], sizes = [1, 64], strides = [1, 1]} : vector<8x64xf32> to vector<1x64xf32>
    %c0_11 = arith.constant 0 : index
    %c0_12 = arith.constant 0 : index
    %c0_13 = arith.constant 0 : index
    %11 = vector.load %arg2[%c0_11, %c0_12, %c0_13] : memref<8x64x16xf32, #tpu.memory_space<vmem>>, vector<1x64x16xf32>
    %12 = vector.shape_cast %11 : vector<1x64x16xf32> to vector<64x16xf32>
    %cst_14 = arith.constant dense<0.000000e+00> : vector<1x16xf32>
    %13 = tpu.matmul %10, %12, %cst_14 {dimension_numbers = #tpu.dot_dimension_numbers<[1], [0], [0], [1], [0, 0, 1, 1], [], []>} : vector<1x64xf32>, vector<64x16xf32>, vector<1x16xf32> -> vector<1x16xf32>
    %14 = arith.addf %8, %13 : vector<1x16xf32>
    %c0_15 = arith.constant 0 : index
    %c0_16 = arith.constant 0 : index
    %c0_17 = arith.constant 0 : index
    %15 = vector.load %arg3[%c0_15, %c0_16, %c0_17] : memref<8x64x160xf32, #tpu.memory_space<vmem>>, vector<1x64x160xf32>
    %16 = vector.shape_cast %15 : vector<1x64x160xf32> to vector<64x160xf32>
    %cst_18 = arith.constant dense<0.000000e+00> : vector<1x160xf32>
    %17 = tpu.matmul %10, %16, %cst_18 {dimension_numbers = #tpu.dot_dimension_numbers<[1], [0], [0], [1], [0, 0, 1, 1], [], []>} : vector<1x64xf32>, vector<64x160xf32>, vector<1x160xf32> -> vector<1x160xf32>
    %18 = arith.addf %9, %17 : vector<1x160xf32>
    %19 = vector.extract_strided_slice %7 {offsets = [1, 0], sizes = [1, 64], strides = [1, 1]} : vector<8x64xf32> to vector<1x64xf32>
    %c1 = arith.constant 1 : index
    %c0_19 = arith.constant 0 : index
    %c0_20 = arith.constant 0 : index
    %20 = vector.load %arg2[%c1, %c0_19, %c0_20] : memref<8x64x16xf32, #tpu.memory_space<vmem>>, vector<1x64x16xf32>
    %21 = vector.shape_cast %20 : vector<1x64x16xf32> to vector<64x16xf32>
    %cst_21 = arith.constant dense<0.000000e+00> : vector<1x16xf32>
    %22 = tpu.matmul %19, %21, %cst_21 {dimension_numbers = #tpu.dot_dimension_numbers<[1], [0], [0], [1], [0, 0, 1, 1], [], []>} : vector<1x64xf32>, vector<64x16xf32>, vector<1x16xf32> -> vector<1x16xf32>
    %23 = arith.addf %14, %22 : vector<1x16xf32>
    %c1_22 = arith.constant 1 : index
    %c0_23 = arith.constant 0 : index
    %c0_24 = arith.constant 0 : index
    %24 = vector.load %arg3[%c1_22, %c0_23, %c0_24] : memref<8x64x160xf32, #tpu.memory_space<vmem>>, vector<1x64x160xf32>
    %25 = vector.shape_cast %24 : vector<1x64x160xf32> to vector<64x160xf32>
    %cst_25 = arith.constant dense<0.000000e+00> : vector<1x160xf32>
    %26 = tpu.matmul %19, %25, %cst_25 {dimension_numbers = #tpu.dot_dimension_numbers<[1], [0], [0], [1], [0, 0, 1, 1], [], []>} : vector<1x64xf32>, vector<64x160xf32>, vector<1x160xf32> -> vector<1x160xf32>
    %27 = arith.addf %18, %26 : vector<1x160xf32>
    %28 = vector.extract_strided_slice %7 {offsets = [2, 0], sizes = [1, 64], strides = [1, 1]} : vector<8x64xf32> to vector<1x64xf32>
    %c2 = arith.constant 2 : index
    %c0_26 = arith.constant 0 : index
    %c0_27 = arith.constant 0 : index
    %29 = vector.load %arg2[%c2, %c0_26, %c0_27] : memref<8x64x16xf32, #tpu.memory_space<vmem>>, vector<1x64x16xf32>
    %30 = vector.shape_cast %29 : vector<1x64x16xf32> to vector<64x16xf32>
    %cst_28 = arith.constant dense<0.000000e+00> : vector<1x16xf32>
    %31 = tpu.matmul %28, %30, %cst_28 {dimension_numbers = #tpu.dot_dimension_numbers<[1], [0], [0], [1], [0, 0, 1, 1], [], []>} : vector<1x64xf32>, vector<64x16xf32>, vector<1x16xf32> -> vector<1x16xf32>
    %32 = arith.addf %23, %31 : vector<1x16xf32>
    %c2_29 = arith.constant 2 : index
    %c0_30 = arith.constant 0 : index
    %c0_31 = arith.constant 0 : index
    %33 = vector.load %arg3[%c2_29, %c0_30, %c0_31] : memref<8x64x160xf32, #tpu.memory_space<vmem>>, vector<1x64x160xf32>
    %34 = vector.shape_cast %33 : vector<1x64x160xf32> to vector<64x160xf32>
    %cst_32 = arith.constant dense<0.000000e+00> : vector<1x160xf32>
    %35 = tpu.matmul %28, %34, %cst_32 {dimension_numbers = #tpu.dot_dimension_numbers<[1], [0], [0], [1], [0, 0, 1, 1], [], []>} : vector<1x64xf32>, vector<64x160xf32>, vector<1x160xf32> -> vector<1x160xf32>
    %36 = arith.addf %27, %35 : vector<1x160xf32>
    %37 = vector.extract_strided_slice %7 {offsets = [3, 0], sizes = [1, 64], strides = [1, 1]} : vector<8x64xf32> to vector<1x64xf32>
    %c3 = arith.constant 3 : index
    %c0_33 = arith.constant 0 : index
    %c0_34 = arith.constant 0 : index
    %38 = vector.load %arg2[%c3, %c0_33, %c0_34] : memref<8x64x16xf32, #tpu.memory_space<vmem>>, vector<1x64x16xf32>
    %39 = vector.shape_cast %38 : vector<1x64x16xf32> to vector<64x16xf32>
    %cst_35 = arith.constant dense<0.000000e+00> : vector<1x16xf32>
    %40 = tpu.matmul %37, %39, %cst_35 {dimension_numbers = #tpu.dot_dimension_numbers<[1], [0], [0], [1], [0, 0, 1, 1], [], []>} : vector<1x64xf32>, vector<64x16xf32>, vector<1x16xf32> -> vector<1x16xf32>
    %41 = arith.addf %32, %40 : vector<1x16xf32>
    %c3_36 = arith.constant 3 : index
    %c0_37 = arith.constant 0 : index
    %c0_38 = arith.constant 0 : index
    %42 = vector.load %arg3[%c3_36, %c0_37, %c0_38] : memref<8x64x160xf32, #tpu.memory_space<vmem>>, vector<1x64x160xf32>
    %43 = vector.shape_cast %42 : vector<1x64x160xf32> to vector<64x160xf32>
    %cst_39 = arith.constant dense<0.000000e+00> : vector<1x160xf32>
    %44 = tpu.matmul %37, %43, %cst_39 {dimension_numbers = #tpu.dot_dimension_numbers<[1], [0], [0], [1], [0, 0, 1, 1], [], []>} : vector<1x64xf32>, vector<64x160xf32>, vector<1x160xf32> -> vector<1x160xf32>
    %45 = arith.addf %36, %44 : vector<1x160xf32>
    %46 = vector.extract_strided_slice %7 {offsets = [4, 0], sizes = [1, 64], strides = [1, 1]} : vector<8x64xf32> to vector<1x64xf32>
    %c4 = arith.constant 4 : index
    %c0_40 = arith.constant 0 : index
    %c0_41 = arith.constant 0 : index
    %47 = vector.load %arg2[%c4, %c0_40, %c0_41] : memref<8x64x16xf32, #tpu.memory_space<vmem>>, vector<1x64x16xf32>
    %48 = vector.shape_cast %47 : vector<1x64x16xf32> to vector<64x16xf32>
    %cst_42 = arith.constant dense<0.000000e+00> : vector<1x16xf32>
    %49 = tpu.matmul %46, %48, %cst_42 {dimension_numbers = #tpu.dot_dimension_numbers<[1], [0], [0], [1], [0, 0, 1, 1], [], []>} : vector<1x64xf32>, vector<64x16xf32>, vector<1x16xf32> -> vector<1x16xf32>
    %50 = arith.addf %41, %49 : vector<1x16xf32>
    %c4_43 = arith.constant 4 : index
    %c0_44 = arith.constant 0 : index
    %c0_45 = arith.constant 0 : index
    %51 = vector.load %arg3[%c4_43, %c0_44, %c0_45] : memref<8x64x160xf32, #tpu.memory_space<vmem>>, vector<1x64x160xf32>
    %52 = vector.shape_cast %51 : vector<1x64x160xf32> to vector<64x160xf32>
    %cst_46 = arith.constant dense<0.000000e+00> : vector<1x160xf32>
    %53 = tpu.matmul %46, %52, %cst_46 {dimension_numbers = #tpu.dot_dimension_numbers<[1], [0], [0], [1], [0, 0, 1, 1], [], []>} : vector<1x64xf32>, vector<64x160xf32>, vector<1x160xf32> -> vector<1x160xf32>
    %54 = arith.addf %45, %53 : vector<1x160xf32>
    %55 = vector.extract_strided_slice %7 {offsets = [5, 0], sizes = [1, 64], strides = [1, 1]} : vector<8x64xf32> to vector<1x64xf32>
    %c5 = arith.constant 5 : index
    %c0_47 = arith.constant 0 : index
    %c0_48 = arith.constant 0 : index
    %56 = vector.load %arg2[%c5, %c0_47, %c0_48] : memref<8x64x16xf32, #tpu.memory_space<vmem>>, vector<1x64x16xf32>
    %57 = vector.shape_cast %56 : vector<1x64x16xf32> to vector<64x16xf32>
    %cst_49 = arith.constant dense<0.000000e+00> : vector<1x16xf32>
    %58 = tpu.matmul %55, %57, %cst_49 {dimension_numbers = #tpu.dot_dimension_numbers<[1], [0], [0], [1], [0, 0, 1, 1], [], []>} : vector<1x64xf32>, vector<64x16xf32>, vector<1x16xf32> -> vector<1x16xf32>
    %59 = arith.addf %50, %58 : vector<1x16xf32>
    %c5_50 = arith.constant 5 : index
    %c0_51 = arith.constant 0 : index
    %c0_52 = arith.constant 0 : index
    %60 = vector.load %arg3[%c5_50, %c0_51, %c0_52] : memref<8x64x160xf32, #tpu.memory_space<vmem>>, vector<1x64x160xf32>
    %61 = vector.shape_cast %60 : vector<1x64x160xf32> to vector<64x160xf32>
    %cst_53 = arith.constant dense<0.000000e+00> : vector<1x160xf32>
    %62 = tpu.matmul %55, %61, %cst_53 {dimension_numbers = #tpu.dot_dimension_numbers<[1], [0], [0], [1], [0, 0, 1, 1], [], []>} : vector<1x64xf32>, vector<64x160xf32>, vector<1x160xf32> -> vector<1x160xf32>
    %63 = arith.addf %54, %62 : vector<1x160xf32>
    %64 = vector.extract_strided_slice %7 {offsets = [6, 0], sizes = [1, 64], strides = [1, 1]} : vector<8x64xf32> to vector<1x64xf32>
    %c6 = arith.constant 6 : index
    %c0_54 = arith.constant 0 : index
    %c0_55 = arith.constant 0 : index
    %65 = vector.load %arg2[%c6, %c0_54, %c0_55] : memref<8x64x16xf32, #tpu.memory_space<vmem>>, vector<1x64x16xf32>
    %66 = vector.shape_cast %65 : vector<1x64x16xf32> to vector<64x16xf32>
    %cst_56 = arith.constant dense<0.000000e+00> : vector<1x16xf32>
    %67 = tpu.matmul %64, %66, %cst_56 {dimension_numbers = #tpu.dot_dimension_numbers<[1], [0], [0], [1], [0, 0, 1, 1], [], []>} : vector<1x64xf32>, vector<64x16xf32>, vector<1x16xf32> -> vector<1x16xf32>
    %68 = arith.addf %59, %67 : vector<1x16xf32>
    %c6_57 = arith.constant 6 : index
    %c0_58 = arith.constant 0 : index
    %c0_59 = arith.constant 0 : index
    %69 = vector.load %arg3[%c6_57, %c0_58, %c0_59] : memref<8x64x160xf32, #tpu.memory_space<vmem>>, vector<1x64x160xf32>
    %70 = vector.shape_cast %69 : vector<1x64x160xf32> to vector<64x160xf32>
    %cst_60 = arith.constant dense<0.000000e+00> : vector<1x160xf32>
    %71 = tpu.matmul %64, %70, %cst_60 {dimension_numbers = #tpu.dot_dimension_numbers<[1], [0], [0], [1], [0, 0, 1, 1], [], []>} : vector<1x64xf32>, vector<64x160xf32>, vector<1x160xf32> -> vector<1x160xf32>
    %72 = arith.addf %63, %71 : vector<1x160xf32>
    %73 = vector.extract_strided_slice %7 {offsets = [7, 0], sizes = [1, 64], strides = [1, 1]} : vector<8x64xf32> to vector<1x64xf32>
    %c7 = arith.constant 7 : index
    %c0_61 = arith.constant 0 : index
    %c0_62 = arith.constant 0 : index
    %74 = vector.load %arg2[%c7, %c0_61, %c0_62] : memref<8x64x16xf32, #tpu.memory_space<vmem>>, vector<1x64x16xf32>
    %75 = vector.shape_cast %74 : vector<1x64x16xf32> to vector<64x16xf32>
    %cst_63 = arith.constant dense<0.000000e+00> : vector<1x16xf32>
    %76 = tpu.matmul %73, %75, %cst_63 {dimension_numbers = #tpu.dot_dimension_numbers<[1], [0], [0], [1], [0, 0, 1, 1], [], []>} : vector<1x64xf32>, vector<64x16xf32>, vector<1x16xf32> -> vector<1x16xf32>
    %77 = arith.addf %68, %76 : vector<1x16xf32>
    %c7_64 = arith.constant 7 : index
    %c0_65 = arith.constant 0 : index
    %c0_66 = arith.constant 0 : index
    %78 = vector.load %arg3[%c7_64, %c0_65, %c0_66] : memref<8x64x160xf32, #tpu.memory_space<vmem>>, vector<1x64x160xf32>
    %79 = vector.shape_cast %78 : vector<1x64x160xf32> to vector<64x160xf32>
    %cst_67 = arith.constant dense<0.000000e+00> : vector<1x160xf32>
    %80 = tpu.matmul %73, %79, %cst_67 {dimension_numbers = #tpu.dot_dimension_numbers<[1], [0], [0], [1], [0, 0, 1, 1], [], []>} : vector<1x64xf32>, vector<64x160xf32>, vector<1x160xf32> -> vector<1x160xf32>
    %81 = arith.addf %72, %80 : vector<1x160xf32>
    %cst_68 = arith.constant 0.000000e+00 : f32
    %82 = vector.broadcast %cst_68 : f32 to vector<1x16xf32>
    %83 = arith.cmpf oge, %77, %82 : vector<1x16xf32>
    %84 = arith.extui %83 : vector<1x16xi1> to vector<1x16xi32>
    %85 = arith.sitofp %84 : vector<1x16xi32> to vector<1x16xf32>
    %cst_69 = arith.constant dense<0.000000e+00> : vector<1x160xf32>
    %86 = tpu.matmul %85, %1, %cst_69 {dimension_numbers = #tpu.dot_dimension_numbers<[1], [0], [0], [1], [0, 0, 1, 1], [], []>} : vector<1x16xf32>, vector<16x160xf32>, vector<1x160xf32> -> vector<1x160xf32>
    %87 = arith.mulf %86, %81 : vector<1x160xf32>
    %cst_70 = arith.constant dense<0.000000e+00> : vector<1x10xf32>
    %88 = tpu.matmul %87, %2, %cst_70 {dimension_numbers = #tpu.dot_dimension_numbers<[1], [0], [0], [1], [0, 0, 1, 1], [], []>} : vector<1x160xf32>, vector<160x10xf32>, vector<1x10xf32> -> vector<1x10xf32>
    %c0_71 = arith.constant 0 : index
    %c0_72 = arith.constant 0 : index
    %89 = vector.load %arg6[%c0_71, %c0_72] : memref<2x10xf32, #tpu.memory_space<vmem>>, vector<1x10xf32>
    tpu.vector_store %arg6[%c0_71, %c0_72], %88 {strides = array<i32>} : memref<2x10xf32, #tpu.memory_space<vmem>>, vector<1x10xf32>,
    %c1_73 = arith.constant 1 : index
    %c0_74 = arith.constant 0 : index
    %c0_75 = arith.constant 0 : index
    %90 = vector.load %arg1[%c1_73, %c0_74, %c0_75] : memref<2x37x64xf32, #tpu.memory_space<vmem>>, vector<1x37x64xf32>
    %91 = vector.shape_cast %90 : vector<1x37x64xf32> to vector<37x64xf32>
    %cst_76 = arith.constant dense<0.000000e+00> : vector<8x64xf32>
    %92 = tpu.matmul %0, %91, %cst_76 {dimension_numbers = #tpu.dot_dimension_numbers<[1], [0], [0], [1], [0, 0, 1, 1], [], []>} : vector<8x37xf32>, vector<37x64xf32>, vector<8x64xf32> -> vector<8x64xf32>
    %cst_77 = arith.constant 0.000000e+00 : f32
    %93 = vector.broadcast %cst_77 : f32 to vector<8x64xf32>
    %94 = arith.maximumf %92, %93 : vector<8x64xf32>
    %cst_78 = arith.constant 0.000000e+00 : f32
    %95 = vector.broadcast %cst_78 : f32 to vector<1x16xf32>
    %cst_79 = arith.constant 0.000000e+00 : f32
    %96 = vector.broadcast %cst_79 : f32 to vector<1x160xf32>
    %97 = vector.extract_strided_slice %94 {offsets = [0, 0], sizes = [1, 64], strides = [1, 1]} : vector<8x64xf32> to vector<1x64xf32>
    %c0_80 = arith.constant 0 : index
    %c0_81 = arith.constant 0 : index
    %c0_82 = arith.constant 0 : index
    %98 = vector.load %arg2[%c0_80, %c0_81, %c0_82] : memref<8x64x16xf32, #tpu.memory_space<vmem>>, vector<1x64x16xf32>
    %99 = vector.shape_cast %98 : vector<1x64x16xf32> to vector<64x16xf32>
    %cst_83 = arith.constant dense<0.000000e+00> : vector<1x16xf32>
    %100 = tpu.matmul %97, %99, %cst_83 {dimension_numbers = #tpu.dot_dimension_numbers<[1], [0], [0], [1], [0, 0, 1, 1], [], []>} : vector<1x64xf32>, vector<64x16xf32>, vector<1x16xf32> -> vector<1x16xf32>
    %101 = arith.addf %95, %100 : vector<1x16xf32>
    %c0_84 = arith.constant 0 : index
    %c0_85 = arith.constant 0 : index
    %c0_86 = arith.constant 0 : index
    %102 = vector.load %arg3[%c0_84, %c0_85, %c0_86] : memref<8x64x160xf32, #tpu.memory_space<vmem>>, vector<1x64x160xf32>
    %103 = vector.shape_cast %102 : vector<1x64x160xf32> to vector<64x160xf32>
    %cst_87 = arith.constant dense<0.000000e+00> : vector<1x160xf32>
    %104 = tpu.matmul %97, %103, %cst_87 {dimension_numbers = #tpu.dot_dimension_numbers<[1], [0], [0], [1], [0, 0, 1, 1], [], []>} : vector<1x64xf32>, vector<64x160xf32>, vector<1x160xf32> -> vector<1x160xf32>
    %105 = arith.addf %96, %104 : vector<1x160xf32>
    %106 = vector.extract_strided_slice %94 {offsets = [1, 0], sizes = [1, 64], strides = [1, 1]} : vector<8x64xf32> to vector<1x64xf32>
    %c1_88 = arith.constant 1 : index
    %c0_89 = arith.constant 0 : index
    %c0_90 = arith.constant 0 : index
    %107 = vector.load %arg2[%c1_88, %c0_89, %c0_90] : memref<8x64x16xf32, #tpu.memory_space<vmem>>, vector<1x64x16xf32>
    %108 = vector.shape_cast %107 : vector<1x64x16xf32> to vector<64x16xf32>
    %cst_91 = arith.constant dense<0.000000e+00> : vector<1x16xf32>
    %109 = tpu.matmul %106, %108, %cst_91 {dimension_numbers = #tpu.dot_dimension_numbers<[1], [0], [0], [1], [0, 0, 1, 1], [], []>} : vector<1x64xf32>, vector<64x16xf32>, vector<1x16xf32> -> vector<1x16xf32>
    %110 = arith.addf %101, %109 : vector<1x16xf32>
    %c1_92 = arith.constant 1 : index
    %c0_93 = arith.constant 0 : index
    %c0_94 = arith.constant 0 : index
    %111 = vector.load %arg3[%c1_92, %c0_93, %c0_94] : memref<8x64x160xf32, #tpu.memory_space<vmem>>, vector<1x64x160xf32>
    %112 = vector.shape_cast %111 : vector<1x64x160xf32> to vector<64x160xf32>
    %cst_95 = arith.constant dense<0.000000e+00> : vector<1x160xf32>
    %113 = tpu.matmul %106, %112, %cst_95 {dimension_numbers = #tpu.dot_dimension_numbers<[1], [0], [0], [1], [0, 0, 1, 1], [], []>} : vector<1x64xf32>, vector<64x160xf32>, vector<1x160xf32> -> vector<1x160xf32>
    %114 = arith.addf %105, %113 : vector<1x160xf32>
    %115 = vector.extract_strided_slice %94 {offsets = [2, 0], sizes = [1, 64], strides = [1, 1]} : vector<8x64xf32> to vector<1x64xf32>
    %c2_96 = arith.constant 2 : index
    %c0_97 = arith.constant 0 : index
    %c0_98 = arith.constant 0 : index
    %116 = vector.load %arg2[%c2_96, %c0_97, %c0_98] : memref<8x64x16xf32, #tpu.memory_space<vmem>>, vector<1x64x16xf32>
    %117 = vector.shape_cast %116 : vector<1x64x16xf32> to vector<64x16xf32>
    %cst_99 = arith.constant dense<0.000000e+00> : vector<1x16xf32>
    %118 = tpu.matmul %115, %117, %cst_99 {dimension_numbers = #tpu.dot_dimension_numbers<[1], [0], [0], [1], [0, 0, 1, 1], [], []>} : vector<1x64xf32>, vector<64x16xf32>, vector<1x16xf32> -> vector<1x16xf32>
    %119 = arith.addf %110, %118 : vector<1x16xf32>
    %c2_100 = arith.constant 2 : index
    %c0_101 = arith.constant 0 : index
    %c0_102 = arith.constant 0 : index
    %120 = vector.load %arg3[%c2_100, %c0_101, %c0_102] : memref<8x64x160xf32, #tpu.memory_space<vmem>>, vector<1x64x160xf32>
    %121 = vector.shape_cast %120 : vector<1x64x160xf32> to vector<64x160xf32>
    %cst_103 = arith.constant dense<0.000000e+00> : vector<1x160xf32>
    %122 = tpu.matmul %115, %121, %cst_103 {dimension_numbers = #tpu.dot_dimension_numbers<[1], [0], [0], [1], [0, 0, 1, 1], [], []>} : vector<1x64xf32>, vector<64x160xf32>, vector<1x160xf32> -> vector<1x160xf32>
    %123 = arith.addf %114, %122 : vector<1x160xf32>
    %124 = vector.extract_strided_slice %94 {offsets = [3, 0], sizes = [1, 64], strides = [1, 1]} : vector<8x64xf32> to vector<1x64xf32>
    %c3_104 = arith.constant 3 : index
    %c0_105 = arith.constant 0 : index
    %c0_106 = arith.constant 0 : index
    %125 = vector.load %arg2[%c3_104, %c0_105, %c0_106] : memref<8x64x16xf32, #tpu.memory_space<vmem>>, vector<1x64x16xf32>
    %126 = vector.shape_cast %125 : vector<1x64x16xf32> to vector<64x16xf32>
    %cst_107 = arith.constant dense<0.000000e+00> : vector<1x16xf32>
    %127 = tpu.matmul %124, %126, %cst_107 {dimension_numbers = #tpu.dot_dimension_numbers<[1], [0], [0], [1], [0, 0, 1, 1], [], []>} : vector<1x64xf32>, vector<64x16xf32>, vector<1x16xf32> -> vector<1x16xf32>
    %128 = arith.addf %119, %127 : vector<1x16xf32>
    %c3_108 = arith.constant 3 : index
    %c0_109 = arith.constant 0 : index
    %c0_110 = arith.constant 0 : index
    %129 = vector.load %arg3[%c3_108, %c0_109, %c0_110] : memref<8x64x160xf32, #tpu.memory_space<vmem>>, vector<1x64x160xf32>
    %130 = vector.shape_cast %129 : vector<1x64x160xf32> to vector<64x160xf32>
    %cst_111 = arith.constant dense<0.000000e+00> : vector<1x160xf32>
    %131 = tpu.matmul %124, %130, %cst_111 {dimension_numbers = #tpu.dot_dimension_numbers<[1], [0], [0], [1], [0, 0, 1, 1], [], []>} : vector<1x64xf32>, vector<64x160xf32>, vector<1x160xf32> -> vector<1x160xf32>
    %132 = arith.addf %123, %131 : vector<1x160xf32>
    %133 = vector.extract_strided_slice %94 {offsets = [4, 0], sizes = [1, 64], strides = [1, 1]} : vector<8x64xf32> to vector<1x64xf32>
    %c4_112 = arith.constant 4 : index
    %c0_113 = arith.constant 0 : index
    %c0_114 = arith.constant 0 : index
    %134 = vector.load %arg2[%c4_112, %c0_113, %c0_114] : memref<8x64x16xf32, #tpu.memory_space<vmem>>, vector<1x64x16xf32>
    %135 = vector.shape_cast %134 : vector<1x64x16xf32> to vector<64x16xf32>
    %cst_115 = arith.constant dense<0.000000e+00> : vector<1x16xf32>
    %136 = tpu.matmul %133, %135, %cst_115 {dimension_numbers = #tpu.dot_dimension_numbers<[1], [0], [0], [1], [0, 0, 1, 1], [], []>} : vector<1x64xf32>, vector<64x16xf32>, vector<1x16xf32> -> vector<1x16xf32>
    %137 = arith.addf %128, %136 : vector<1x16xf32>
    %c4_116 = arith.constant 4 : index
    %c0_117 = arith.constant 0 : index
    %c0_118 = arith.constant 0 : index
    %138 = vector.load %arg3[%c4_116, %c0_117, %c0_118] : memref<8x64x160xf32, #tpu.memory_space<vmem>>, vector<1x64x160xf32>
    %139 = vector.shape_cast %138 : vector<1x64x160xf32> to vector<64x160xf32>
    %cst_119 = arith.constant dense<0.000000e+00> : vector<1x160xf32>
    %140 = tpu.matmul %133, %139, %cst_119 {dimension_numbers = #tpu.dot_dimension_numbers<[1], [0], [0], [1], [0, 0, 1, 1], [], []>} : vector<1x64xf32>, vector<64x160xf32>, vector<1x160xf32> -> vector<1x160xf32>
    %141 = arith.addf %132, %140 : vector<1x160xf32>
    %142 = vector.extract_strided_slice %94 {offsets = [5, 0], sizes = [1, 64], strides = [1, 1]} : vector<8x64xf32> to vector<1x64xf32>
    %c5_120 = arith.constant 5 : index
    %c0_121 = arith.constant 0 : index
    %c0_122 = arith.constant 0 : index
    %143 = vector.load %arg2[%c5_120, %c0_121, %c0_122] : memref<8x64x16xf32, #tpu.memory_space<vmem>>, vector<1x64x16xf32>
    %144 = vector.shape_cast %143 : vector<1x64x16xf32> to vector<64x16xf32>
    %cst_123 = arith.constant dense<0.000000e+00> : vector<1x16xf32>
    %145 = tpu.matmul %142, %144, %cst_123 {dimension_numbers = #tpu.dot_dimension_numbers<[1], [0], [0], [1], [0, 0, 1, 1], [], []>} : vector<1x64xf32>, vector<64x16xf32>, vector<1x16xf32> -> vector<1x16xf32>
    %146 = arith.addf %137, %145 : vector<1x16xf32>
    %c5_124 = arith.constant 5 : index
    %c0_125 = arith.constant 0 : index
    %c0_126 = arith.constant 0 : index
    %147 = vector.load %arg3[%c5_124, %c0_125, %c0_126] : memref<8x64x160xf32, #tpu.memory_space<vmem>>, vector<1x64x160xf32>
    %148 = vector.shape_cast %147 : vector<1x64x160xf32> to vector<64x160xf32>
    %cst_127 = arith.constant dense<0.000000e+00> : vector<1x160xf32>
    %149 = tpu.matmul %142, %148, %cst_127 {dimension_numbers = #tpu.dot_dimension_numbers<[1], [0], [0], [1], [0, 0, 1, 1], [], []>} : vector<1x64xf32>, vector<64x160xf32>, vector<1x160xf32> -> vector<1x160xf32>
    %150 = arith.addf %141, %149 : vector<1x160xf32>
    %151 = vector.extract_strided_slice %94 {offsets = [6, 0], sizes = [1, 64], strides = [1, 1]} : vector<8x64xf32> to vector<1x64xf32>
    %c6_128 = arith.constant 6 : index
    %c0_129 = arith.constant 0 : index
    %c0_130 = arith.constant 0 : index
    %152 = vector.load %arg2[%c6_128, %c0_129, %c0_130] : memref<8x64x16xf32, #tpu.memory_space<vmem>>, vector<1x64x16xf32>
    %153 = vector.shape_cast %152 : vector<1x64x16xf32> to vector<64x16xf32>
    %cst_131 = arith.constant dense<0.000000e+00> : vector<1x16xf32>
    %154 = tpu.matmul %151, %153, %cst_131 {dimension_numbers = #tpu.dot_dimension_numbers<[1], [0], [0], [1], [0, 0, 1, 1], [], []>} : vector<1x64xf32>, vector<64x16xf32>, vector<1x16xf32> -> vector<1x16xf32>
    %155 = arith.addf %146, %154 : vector<1x16xf32>
    %c6_132 = arith.constant 6 : index
    %c0_133 = arith.constant 0 : index
    %c0_134 = arith.constant 0 : index
    %156 = vector.load %arg3[%c6_132, %c0_133, %c0_134] : memref<8x64x160xf32, #tpu.memory_space<vmem>>, vector<1x64x160xf32>
    %157 = vector.shape_cast %156 : vector<1x64x160xf32> to vector<64x160xf32>
    %cst_135 = arith.constant dense<0.000000e+00> : vector<1x160xf32>
    %158 = tpu.matmul %151, %157, %cst_135 {dimension_numbers = #tpu.dot_dimension_numbers<[1], [0], [0], [1], [0, 0, 1, 1], [], []>} : vector<1x64xf32>, vector<64x160xf32>, vector<1x160xf32> -> vector<1x160xf32>
    %159 = arith.addf %150, %158 : vector<1x160xf32>
    %160 = vector.extract_strided_slice %94 {offsets = [7, 0], sizes = [1, 64], strides = [1, 1]} : vector<8x64xf32> to vector<1x64xf32>
    %c7_136 = arith.constant 7 : index
    %c0_137 = arith.constant 0 : index
    %c0_138 = arith.constant 0 : index
    %161 = vector.load %arg2[%c7_136, %c0_137, %c0_138] : memref<8x64x16xf32, #tpu.memory_space<vmem>>, vector<1x64x16xf32>
    %162 = vector.shape_cast %161 : vector<1x64x16xf32> to vector<64x16xf32>
    %cst_139 = arith.constant dense<0.000000e+00> : vector<1x16xf32>
    %163 = tpu.matmul %160, %162, %cst_139 {dimension_numbers = #tpu.dot_dimension_numbers<[1], [0], [0], [1], [0, 0, 1, 1], [], []>} : vector<1x64xf32>, vector<64x16xf32>, vector<1x16xf32> -> vector<1x16xf32>
    %164 = arith.addf %155, %163 : vector<1x16xf32>
    %c7_140 = arith.constant 7 : index
    %c0_141 = arith.constant 0 : index
    %c0_142 = arith.constant 0 : index
    %165 = vector.load %arg3[%c7_140, %c0_141, %c0_142] : memref<8x64x160xf32, #tpu.memory_space<vmem>>, vector<1x64x160xf32>
    %166 = vector.shape_cast %165 : vector<1x64x160xf32> to vector<64x160xf32>
    %cst_143 = arith.constant dense<0.000000e+00> : vector<1x160xf32>
    %167 = tpu.matmul %160, %166, %cst_143 {dimension_numbers = #tpu.dot_dimension_numbers<[1], [0], [0], [1], [0, 0, 1, 1], [], []>} : vector<1x64xf32>, vector<64x160xf32>, vector<1x160xf32> -> vector<1x160xf32>
    %168 = arith.addf %159, %167 : vector<1x160xf32>
    %cst_144 = arith.constant 0.000000e+00 : f32
    %169 = vector.broadcast %cst_144 : f32 to vector<1x16xf32>
    %170 = arith.cmpf oge, %164, %169 : vector<1x16xf32>
    %171 = arith.extui %170 : vector<1x16xi1> to vector<1x16xi32>
    %172 = arith.sitofp %171 : vector<1x16xi32> to vector<1x16xf32>
    %cst_145 = arith.constant dense<0.000000e+00> : vector<1x160xf32>
    %173 = tpu.matmul %172, %1, %cst_145 {dimension_numbers = #tpu.dot_dimension_numbers<[1], [0], [0], [1], [0, 0, 1, 1], [], []>} : vector<1x16xf32>, vector<16x160xf32>, vector<1x160xf32> -> vector<1x160xf32>
    %174 = arith.mulf %173, %168 : vector<1x160xf32>
    %cst_146 = arith.constant dense<0.000000e+00> : vector<1x10xf32>
    %175 = tpu.matmul %174, %2, %cst_146 {dimension_numbers = #tpu.dot_dimension_numbers<[1], [0], [0], [1], [0, 0, 1, 1], [], []>} : vector<1x160xf32>, vector<160x10xf32>, vector<1x10xf32> -> vector<1x10xf32>
    %c1_147 = arith.constant 1 : index
    %c0_148 = arith.constant 0 : index
    %176 = vector.load %arg6[%c1_147, %c0_148] : memref<2x10xf32, #tpu.memory_space<vmem>>, vector<1x10xf32>
    tpu.vector_store %arg6[%c1_147, %c0_148], %175 {strides = array<i32>} : memref<2x10xf32, #tpu.memory_space<vmem>>, vector<1x10xf32>,
    return
  }
}

</mosaic_0001>

<bundles_post_ra>
// kernel: spliced_forward.1
= control target key start
LH: loop header
LB: loop body
LE: loop exit
PB: predicated region body
PF: predicated region fallthrough
CT: control target
= control target key end

     0   :  { %vm58_vm0 = vcmask 1044480   ;;  %v6055_v1 = vmov 0.0   ;;  %vm4199_vm1 = vmmov 0   ;;  %vm54_vm2 = vcmask 302080   ;;  %s6044_s0 = inlined_call_operand.vmem [shape: f32[8,37], index: 0, kind: input, shape index: {}]   ;;  %s6045_s1 = inlined_call_operand.vmem [shape: f32[2,37,64], index: 1, kind: input, shape index: {}]   ;;  %s6046_s2 = inlined_call_operand.vmem [shape: f32[8,64,16], index: 2, kind: input, shape index: {}]   ;;  %s6047_s3 = inlined_call_operand.vmem [shape: f32[8,64,160], index: 3, kind: input, shape index: {}]   ;;  %s6048_s4 = inlined_call_operand.vmem [shape: f32[16,160], index: 4, kind: input, shape index: {}]   ;;  %s6049_s5 = inlined_call_operand.vmem [shape: f32[160,10], index: 5, kind: input, shape index: {}]   ;;  %s6050_s6 = inlined_call_operand.hbm [shape: f32[2,10], index: 6, kind: output, shape index: {}]  }
   0x1   :  { %v53_v0 = vld [vmem:[%s6045_s1 + $0x20] sm:$0x1f]  ;;  %3814 = vmatprep.subr.mxu0 %v6055_v1  ;;  %v52_v2 = vld [vmem:[%s6045_s1 + $0x18] sm:$0xff]  ;;  %394 = vmatprep.mubr.f32.mxu1 %v6055_v1  ;;  %v3301_v4 = vld [vmem:[%s6047_s3 + $0xf0] sm:$0xff] }
   0x2   :  { %3815 = vmatpush3.msk.msra.mxu0 %vm58_vm0, %v53_v0  ;;  %3824 = vmatprep.mubr.msk.f32.mxu0 %vm4199_vm1, %v6055_v1  ;;  %v3302_v3 = vld [vmem:[%s6047_s3 + $0xf8] sm:$0xff]  ;;  %v51_v5 = vld [vmem:[%s6045_s1 + $0x10] sm:$0xff]  ;;  %v3300_v6 = vld [vmem:[%s6047_s3 + $0xe8] sm:$0xff] }
   0x3   :  { %3816 = vmatprep.subr.mxu0 %v6055_v1  ;;  %346 = vmatprep.subr.mxu1 %v3302_v3  ;;  %v3299_v7 = vld [vmem:[%s6047_s3 + $0xe0] sm:$0xff]  ;;  %v3298_v8 = vld [vmem:[%s6047_s3 + $0xd8] sm:$0xff]  ;;  %v50_v9 = vld [vmem:[%s6045_s1 + $0x8] sm:$0xff] }
   0x4   :  { %3817 = vmatpush3.msra.mxu0 %v52_v2  ;;  %347 = vmatpush1.msra.mxu1 %v3301_v4  ;;  %v3297_v10 = vld [vmem:[%s6047_s3 + $0xd0] sm:$0xff]  ;;  %v3296_v11 = vld [vmem:[%s6047_s3 + $0xc8] sm:$0xff]  ;;  %v49_v12 = vld [vmem:[%s6045_s1] sm:$0xff] }
   0x5   :  { %3818 = vmatprep.subr.mxu0 %v6055_v1  ;;  %348 = vmatprep.subr.mxu1 %v3300_v6  ;;  %v3295_v13 = vld [vmem:[%s6047_s3 + $0xc0] sm:$0xff] }
   0x6   :  { %3819 = vmatpush3.msra.mxu0 %v51_v5  ;;  %349 = vmatpush1.msra.mxu1 %v3299_v7  ;;  %v4286_v14 = vld [vmem:[%s6044_s0] sm:$0xff] }
   0x7   :  { %3820 = vmatprep.subr.mxu0 %v6055_v1  ;;  %350 = vmatprep.subr.mxu1 %v3298_v8 }
   0x8   :  { %3821 = vmatpush3.msra.mxu0 %v50_v9  ;;  %351 = vmatpush1.msra.mxu1 %v3297_v10 }
   0x9   :  { %11 = vsyncpa [#allocation3], 0  ;;  %3822 = vmatprep.subr.mxu0 %v6055_v1  ;;  %v3284_v15 = vld [vmem:[%s6046_s2 + $0x78] sm:$0xff]  ;;  %352 = vmatprep.subr.mxu1 %v3296_v11  ;;  %v3293_v17 = vld [vmem:[%s6047_s3 + $0xb0] sm:$0xff]  ;;  %vm168_vm3 = vcmask 523264   ;;  %vm1513_vm4 = vcmask 130048  }
   0xa   :  { %v3294_v16 = vld [vmem:[%s6047_s3 + $0xb8] sm:$0xff]  ;;  %3823 = vmatpush3.msra.mxu0 %v49_v12  ;;  %353 = vmatpush1.msra.mxu1 %v3295_v13  ;;  %v3283_v18 = vld [vmem:[%s6046_s2 + $0x70] sm:$0xff]  ;;  %v3292_v19 = vld [vmem:[%s6047_s3 + $0xa8] sm:$0xff]  ;;  %vm1590_vm6 = vcmask 261120   ;;  %vm1664_vm7 = vcmask 73728  }
   0xb   :  { %3825 = vmatmul.mubr.msk.f32.vlgmr.msra.gmra.mxu0 %vm54_vm2, %v4286_v14  ;;  %3827 = vmatprep.subr.mxu0 %v6055_v1  ;;  %v3291_v20 = vld [vmem:[%s6047_s3 + $0xa0] sm:$0xff]  ;;  %v3282_v21 = vld [vmem:[%s6046_s2 + $0x68] sm:$0xff]  ;;  %v3280_v23 = vld [vmem:[%s6046_s2 + $0x58] sm:$0xff] }
   0xc   :  { %3828 = vmatpush3.msra.mxu0 %v3284_v15  ;;  %354 = vmatprep.subr.mxu1 %v3294_v16  ;;  %v3281_v22 = vld [vmem:[%s6046_s2 + $0x60] sm:$0xff]  ;;  %v3279_v24 = vld [vmem:[%s6046_s2 + $0x50] sm:$0xff]  ;;  %v3290_v25 = vld [vmem:[%s6047_s3 + $0x98] sm:$0xff] }
   0xd   :  { %3829 = vmatprep.subr.mxu0 %v6055_v1  ;;  %355 = vmatpush1.msra.mxu1 %v3293_v17  ;;  %v3278_v26 = vld [vmem:[%s6046_s2 + $0x48] sm:$0xff]  ;;  %v3289_v27 = vld [vmem:[%s6047_s3 + $0x90] sm:$0xff]  ;;  %v3277_v29 = vld [vmem:[%s6046_s2 + $0x40] sm:$0xff] }
   0xe   :  { %3830 = vmatpush3.msra.mxu0 %v3283_v18  ;;  %356 = vmatprep.subr.mxu1 %v3292_v19  ;;  %v3288_v28 = vld [vmem:[%s6047_s3 + $0x88] sm:$0xff]  ;;  %v3287_v30 = vld [vmem:[%s6047_s3 + $0x80] sm:$0xff]  ;;  %v140_v35 = vld [vmem:[%s6046_s2 + $0x38] sm:$0xff] }
   0xf   :  { %3831 = vmatprep.subr.mxu0 %v6055_v1  ;;  %357 = vmatpush1.msra.mxu1 %v3291_v20  ;;  %v3312_v36 = vld [vmem:[%s6046_s2 + $0xb8] sm:$0xff]  ;;  %v139_v37 = vld [vmem:[%s6046_s2 + $0x30] sm:$0xff]  ;;  %v138_v39 = vld [vmem:[%s6046_s2 + $0x28] sm:$0xff] }
  0x10   :  { %3832 = vmatpush3.msra.mxu0 %v3282_v21  ;;  %3843 = vmatprep.mubr.msk.f32.mxu0 %vm4199_vm1, %v6055_v1  ;;  %v3311_v38 = vld [vmem:[%s6046_s2 + $0xb0] sm:$0xff]  ;;  %v3310_v40 = vld [vmem:[%s6046_s2 + $0xa8] sm:$0xff]  ;;  %v137_v41 = vld [vmem:[%s6046_s2 + $0x20] sm:$0xff] }
  0x11   :  { %3833 = vmatprep.subr.mxu0 %v6055_v1  ;;  %358 = vmatprep.subr.mxu1 %v3290_v25  ;;  %v3309_v42 = vld [vmem:[%s6046_s2 + $0xa0] sm:$0xff]  ;;  %v136_v43 = vld [vmem:[%s6046_s2 + $0x18] sm:$0xff]  ;;  %v135_v45 = vld [vmem:[%s6046_s2 + $0x10] sm:$0xff] }
  0x12   :  { %3834 = vmatpush3.msra.mxu0 %v3281_v22  ;;  %359 = vmatpush1.msra.mxu1 %v3289_v27  ;;  %v3308_v44 = vld [vmem:[%s6046_s2 + $0x98] sm:$0xff]  ;;  %v3307_v46 = vld [vmem:[%s6046_s2 + $0x90] sm:$0xff]  ;;  %v134_v47 = vld [vmem:[%s6046_s2 + $0x8] sm:$0xff] }
  0x13   :  { %3835 = vmatprep.subr.mxu0 %v6055_v1  ;;  %360 = vmatprep.subr.mxu1 %v3288_v28  ;;  %v3306_v48 = vld [vmem:[%s6046_s2 + $0x88] sm:$0xff]  ;;  %v133_v49 = vld [vmem:[%s6046_s2] sm:$0xff]  ;;  %v156_v51 = vld [vmem:[%s6047_s3 + $0x78] sm:$0xff] }
  0x14   :  { %3836 = vmatpush3.msra.mxu0 %v3280_v23  ;;  %361 = vmatpush1.msra.mxu1 %v3287_v30  ;;  %v3305_v50 = vld [vmem:[%s6046_s2 + $0x80] sm:$0xff]  ;;  %v155_v53 = vld [vmem:[%s6047_s3 + $0x70] sm:$0xff]  ;;  %v3338_v54 = vld [vmem:[%s6046_s2 + $0xf8] sm:$0xff] }
  0x15   :  { %3837 = vmatprep.subr.mxu0 %v6055_v1  ;;  %3865 = vmatprep.subr.mxu1 %v6055_v1  ;;  %v154_v55 = vld [vmem:[%s6047_s3 + $0x68] sm:$0xff]  ;;  %v153_v56 = vld [vmem:[%s6047_s3 + $0x60] sm:$0xff]  ;;  %v3337_v57 = vld [vmem:[%s6046_s2 + $0xf0] sm:$0xff] }
  0x16   :  { %3838 = vmatpush3.msra.mxu0 %v3279_v24  ;;  %v152_v58 = vld [vmem:[%s6047_s3 + $0x58] sm:$0xff]  ;;  %v151_v59 = vld [vmem:[%s6047_s3 + $0x50] sm:$0xff]  ;;  %v3336_v60 = vld [vmem:[%s6046_s2 + $0xe8] sm:$0xff] }
  0x17   :  { %3839 = vmatprep.subr.mxu0 %v6055_v1  ;;  %v150_v61 = vld [vmem:[%s6047_s3 + $0x48] sm:$0xff]  ;;  %v149_v62 = vld [vmem:[%s6047_s3 + $0x40] sm:$0xff]  ;;  %v148_v0 = vld [vmem:[%s6047_s3 + $0x38] sm:$0xff] }
  0x18   :  { %3840 = vmatpush3.msra.mxu0 %v3278_v26  ;;  %v3335_v63 = vld [vmem:[%s6046_s2 + $0xe0] sm:$0xff]  ;;  %v147_v2 = vld [vmem:[%s6047_s3 + $0x30] sm:$0xff]  ;;  %v3334_v3 = vld [vmem:[%s6046_s2 + $0xd8] sm:$0xff] }
  0x19   :  { %3841 = vmatprep.subr.mxu0 %v6055_v1  ;;  %v146_v4 = vld [vmem:[%s6047_s3 + $0x28] sm:$0xff]  ;;  %v145_v5 = vld [vmem:[%s6047_s3 + $0x20] sm:$0xff]  ;;  %v3333_v6 = vld [vmem:[%s6046_s2 + $0xd0] sm:$0xff] }
  0x1a   :  { %3842 = vmatpush3.msra.mxu0 %v3277_v29  ;;  %v144_v7 = vld [vmem:[%s6047_s3 + $0x18] sm:$0xff]  ;;  %v143_v8 = vld [vmem:[%s6047_s3 + $0x10] sm:$0xff]  ;;  %v3332_v9 = vld [vmem:[%s6046_s2 + $0xc8] sm:$0xff] }
  0x1b   :  { %3846 = vmatprep.subr.mxu0 %v6055_v1  ;;  %v142_v10 = vld [vmem:[%s6047_s3 + $0x8] sm:$0xff]  ;;  %v141_v11 = vld [vmem:[%s6047_s3] sm:$0xff]  ;;  %v3329_v13 = vld [vmem:[%s6047_s3 + $0x178] sm:$0xff] }
  0x1c   :  { %v3331_v12 = vld [vmem:[%s6046_s2 + $0xc0] sm:$0xff]  ;;  %v3328_v16 = vld [vmem:[%s6047_s3 + $0x170] sm:$0xff]  ;;  %v3364_v17 = vld [vmem:[%s6046_s2 + $0x138] sm:$0xff] }
  0x1d   :  { %v3327_v18 = vld [vmem:[%s6047_s3 + $0x168] sm:$0xff]  ;;  %v3326_v19 = vld [vmem:[%s6047_s3 + $0x160] sm:$0xff]  ;;  %v3363_v20 = vld [vmem:[%s6046_s2 + $0x130] sm:$0xff] }
  0x1e   :  { %v3325_v21 = vld [vmem:[%s6047_s3 + $0x158] sm:$0xff]  ;;  %v3324_v22 = vld [vmem:[%s6047_s3 + $0x150] sm:$0xff]  ;;  %v3362_v23 = vld [vmem:[%s6046_s2 + $0x128] sm:$0xff] }
  0x1f   :  { %v3323_v24 = vld [vmem:[%s6047_s3 + $0x148] sm:$0xff]  ;;  %v3322_v25 = vld [vmem:[%s6047_s3 + $0x140] sm:$0xff]  ;;  %v3321_v27 = vld [vmem:[%s6047_s3 + $0x138] sm:$0xff] }
  0x20   :  { %v3361_v26 = vld [vmem:[%s6046_s2 + $0x120] sm:$0xff]  ;;  %v3320_v28 = vld [vmem:[%s6047_s3 + $0x130] sm:$0xff]  ;;  %v3360_v29 = vld [vmem:[%s6046_s2 + $0x118] sm:$0xff] }
  0x21   :  { %v4569_v30 = vld [vmem:[%s6047_s3 + $0x128] sm:$0xff] }
  0xcb   :  { %v128_v31 = vpop.f32.mrf.mxu0 }
  0xcc   :  { %v4351_v32 = vmax.f32 %v128_v31, 0.0  ;;  %v4575_v31 = vld [vmem:[%s6047_s3 + $0x120] sm:$0xff] }
  0xcd   :  { %v3826_v33 = vpop.f32.mrf.mxu0 }
  0xce   :  { %v167_v34 = vrot.slane %v4351_v32, 1  ;;  %v481_v52 = vrot.slane %v4351_v32, 2  ;;  %v654_v15 = vrot.slane %v4351_v32, 3  ;;  %v3359_v33 = vld [vmem:[%s6046_s2 + $0x110] sm:$0xff] }
  0xd0   :  { %3844 = vmatmul.mubr.msk.f32.vlgmr.msra.gmra.mxu0 %vm168_vm3, %v167_v34  ;;  %3303 = vmatmul.mubr.msk.f32.vlgmr.msra.gmra.mxu1 %vm168_vm3, %v167_v34  ;;  %v4583_v34 = vld [vmem:[%s6047_s3 + $0x118] sm:$0xff] }
  0xd1   :  { %3847 = vmatpush3.msra.mxu0 %v140_v35  ;;  %3866 = vmatpush3.msra.mxu1 %v3312_v36  ;;  %v4590_v35 = vld [vmem:[%s6047_s3 + $0x110] sm:$0xff]  ;;  %v3358_v36 = vld [vmem:[%s6046_s2 + $0x108] sm:$0xff] }
  0xd2   :  { %3848 = vmatprep.subr.mxu0 %v6055_v1  ;;  %3867 = vmatprep.subr.mxu1 %v6055_v1 }
  0xd3   :  { %3849 = vmatpush3.msra.mxu0 %v139_v37  ;;  %3868 = vmatpush3.msra.mxu1 %v3311_v38  ;;  %v4599_v37 = vld [vmem:[%s6047_s3 + $0x108] sm:$0xff]  ;;  %v4606_v38 = vld [vmem:[%s6047_s3 + $0x100] sm:$0xff] }
  0xd4   :  { %3850 = vmatprep.subr.mxu0 %v6055_v1  ;;  %3869 = vmatprep.subr.mxu1 %v6055_v1 }
  0xd5   :  { %3851 = vmatpush3.msra.mxu0 %v138_v39  ;;  %3870 = vmatpush3.msra.mxu1 %v3310_v40  ;;  %v3357_v39 = vld [vmem:[%s6046_s2 + $0x100] sm:$0xff]  ;;  %v4617_v40 = vld [vmem:[%s6047_s3 + $0x1f8] sm:$0xff] }
  0xd6   :  { %3852 = vmatprep.subr.mxu0 %v6055_v1  ;;  %3871 = vmatprep.subr.mxu1 %v6055_v1 }
  0xd7   :  { %3853 = vmatpush3.msra.mxu0 %v137_v41  ;;  %3872 = vmatpush3.msra.mxu1 %v3309_v42  ;;  %v827_v41 = vrot.slane %v4351_v32, 4  ;;  %v4627_v42 = vld [vmem:[%s6047_s3 + $0x1f0] sm:$0xff] }
  0xd8   :  { %3854 = vmatprep.subr.mxu0 %v6055_v1  ;;  %3873 = vmatprep.subr.mxu1 %v6055_v1 }
  0xd9   :  { %3855 = vmatpush3.msra.mxu0 %v136_v43  ;;  %3874 = vmatpush3.msra.mxu1 %v3308_v44  ;;  %v3390_v43 = vld [vmem:[%s6046_s2 + $0x178] sm:$0xff]  ;;  %v4639_v44 = vld [vmem:[%s6047_s3 + $0x1e8] sm:$0xff] }
  0xda   :  { %3856 = vmatprep.subr.mxu0 %v6055_v1  ;;  %3875 = vmatprep.subr.mxu1 %v6055_v1 }
  0xdb   :  { %3857 = vmatpush3.msra.mxu0 %v135_v45  ;;  %3876 = vmatpush3.msra.mxu1 %v3307_v46  ;;  %v4648_v45 = vld [vmem:[%s6047_s3 + $0x1e0] sm:$0xff]  ;;  %v3389_v46 = vld [vmem:[%s6046_s2 + $0x170] sm:$0xff] }
  0xdc   :  { %3858 = vmatprep.subr.mxu0 %v6055_v1  ;;  %3877 = vmatprep.subr.mxu1 %v6055_v1 }
  0xdd   :  { %3859 = vmatpush3.msra.mxu0 %v134_v47  ;;  %3878 = vmatpush3.msra.mxu1 %v3306_v48  ;;  %v4657_v47 = vld [vmem:[%s6047_s3 + $0x1d8] sm:$0xff]  ;;  %v4664_v48 = vld [vmem:[%s6047_s3 + $0x1d0] sm:$0xff] }
  0xde   :  { %3860 = vmatprep.subr.mxu0 %v6055_v1  ;;  %3879 = vmatprep.subr.mxu1 %v6055_v1 }
  0xdf   :  { %3861 = vmatpush3.msra.mxu0 %v133_v49  ;;  %3862 = vmatprep.mubr.msk.f32.mxu0 %vm4199_vm1, %v6055_v1  ;;  %v3388_v49 = vld [vmem:[%s6046_s2 + $0x168] sm:$0xff] }
  0xe0   :  { %3880 = vmatpush3.msra.mxu1 %v3305_v50  ;;  %3881 = vmatprep.mubr.msk.f32.mxu1 %vm4199_vm1, %v6055_v1  ;;  %v4673_v50 = vld [vmem:[%s6047_s3 + $0x1c8] sm:$0xff] }
  0xe1   :  { %3863 = vmatmul.mubr.msk.f32.vlgmr.msra.gmra.mxu0 %vm168_vm3, %v4351_v32  ;;  %417 = vmatprep.subr.mxu0 %v156_v51  ;;  %v4680_v51 = vld [vmem:[%s6047_s3 + $0x1c0] sm:$0xff] }
  0xe2   :  { %3882 = vmatmul.mubr.msk.f32.vlgmr.msra.gmra.mxu1 %vm168_vm3, %v481_v52  ;;  %3884 = vmatprep.subr.mxu1 %v6055_v1 }
  0xe3   :  { %418 = vmatpush1.msra.mxu0 %v155_v53  ;;  %3885 = vmatpush3.msra.mxu1 %v3338_v54  ;;  %v4689_v53 = vld [vmem:[%s6047_s3 + $0x1b8] sm:$0xff]  ;;  %v4696_v54 = vld [vmem:[%s6047_s3 + $0x1b0] sm:$0xff] }
  0xe4   :  { %419 = vmatprep.subr.mxu0 %v154_v55  ;;  %3886 = vmatprep.subr.mxu1 %v6055_v1  ;;  %v3386_v55 = vld [vmem:[%s6046_s2 + $0x158] sm:$0xff] }
  0xe5   :  { %420 = vmatpush1.msra.mxu0 %v153_v56  ;;  %3887 = vmatpush3.msra.mxu1 %v3337_v57  ;;  %v4705_v56 = vld [vmem:[%s6047_s3 + $0x1a8] sm:$0xff]  ;;  %v4712_v57 = vld [vmem:[%s6047_s3 + $0x1a0] sm:$0xff] }
  0xe6   :  { %421 = vmatprep.subr.mxu0 %v152_v58  ;;  %3888 = vmatprep.subr.mxu1 %v6055_v1  ;;  %v3385_v58 = vld [vmem:[%s6046_s2 + $0x150] sm:$0xff] }
  0xe7   :  { %422 = vmatpush1.msra.mxu0 %v151_v59  ;;  %3889 = vmatpush3.msra.mxu1 %v3336_v60  ;;  %v4721_v59 = vld [vmem:[%s6047_s3 + $0x198] sm:$0xff]  ;;  %v4728_v60 = vld [vmem:[%s6047_s3 + $0x190] sm:$0xff] }
  0xe8   :  { %423 = vmatprep.subr.mxu0 %v150_v61  ;;  %3890 = vmatprep.subr.mxu1 %v6055_v1  ;;  %v3384_v61 = vld [vmem:[%s6046_s2 + $0x148] sm:$0xff] }
  0xe9   :  { %424 = vmatpush1.msra.mxu0 %v149_v62  ;;  %3891 = vmatpush3.msra.mxu1 %v3335_v63  ;;  %v4737_v62 = vld [vmem:[%s6047_s3 + $0x188] sm:$0xff]  ;;  %v4744_v63 = vld [vmem:[%s6047_s3 + $0x180] sm:$0xff] }
  0xea   :  { %425 = vmatprep.subr.mxu0 %v148_v0  ;;  %3892 = vmatprep.subr.mxu1 %v6055_v1  ;;  %v3383_v0 = vld [vmem:[%s6046_s2 + $0x140] sm:$0xff] }
  0xeb   :  { %426 = vmatpush1.msra.mxu0 %v147_v2  ;;  %3893 = vmatpush3.msra.mxu1 %v3334_v3  ;;  %v4755_v2 = vld [vmem:[%s6047_s3 + $0x278] sm:$0xff]  ;;  %v1000_v3 = vrot.slane %v4351_v32, 5 }
  0xec   :  { %427 = vmatprep.subr.mxu0 %v146_v4  ;;  %3894 = vmatprep.subr.mxu1 %v6055_v1  ;;  %v4765_v4 = vld [vmem:[%s6047_s3 + $0x270] sm:$0xff] }
  0xed   :  { %428 = vmatpush1.msra.mxu0 %v145_v5  ;;  %3895 = vmatpush3.msra.mxu1 %v3333_v6  ;;  %v3416_v5 = vld [vmem:[%s6046_s2 + $0x1b8] sm:$0xff]  ;;  %v4777_v6 = vld [vmem:[%s6047_s3 + $0x268] sm:$0xff] }
  0xee   :  { %429 = vmatprep.subr.mxu0 %v144_v7  ;;  %3896 = vmatprep.subr.mxu1 %v6055_v1  ;;  %v4786_v7 = vld [vmem:[%s6047_s3 + $0x260] sm:$0xff] }
  0xef   :  { %430 = vmatpush1.msra.mxu0 %v143_v8  ;;  %3897 = vmatpush3.msra.mxu1 %v3332_v9  ;;  %v3415_v8 = vld [vmem:[%s6046_s2 + $0x1b0] sm:$0xff]  ;;  %v4795_v9 = vld [vmem:[%s6047_s3 + $0x258] sm:$0xff] }
  0xf0   :  { %431 = vmatprep.subr.mxu0 %v142_v10  ;;  %3898 = vmatprep.subr.mxu1 %v6055_v1  ;;  %v4802_v10 = vld [vmem:[%s6047_s3 + $0x250] sm:$0xff] }
  0xf1   :  { %432 = vmatpush1.msra.mxu0 %v141_v11  ;;  %465 = vmatprep.mubr.f32.mxu0 %v6055_v1  ;;  %v3414_v11 = vld [vmem:[%s6046_s2 + $0x1a8] sm:$0xff] }
  0xf2   :  { %3899 = vmatpush3.msra.mxu1 %v3331_v12  ;;  %3900 = vmatprep.mubr.msk.f32.mxu1 %vm4199_vm1, %v6055_v1  ;;  %v4811_v12 = vld [vmem:[%s6047_s3 + $0x248] sm:$0xff] }
  0xf3   :  { %3304 = vmatmul.mubr.msk.f32.vlgmr.msra.gmra.mxu0 %vm168_vm3, %v4351_v32  ;;  %588 = vmatprep.subr.mxu0 %v3329_v13  ;;  %v4818_v13 = vld [vmem:[%s6047_s3 + $0x240] sm:$0xff] }
  0xf4   :  { %3901 = vmatmul.mubr.msk.f32.vlgmr.msra.gmra.mxu1 %vm168_vm3, %v654_v15  ;;  %3903 = vmatprep.subr.mxu1 %v6055_v1 }
  0xf5   :  { %589 = vmatpush1.msra.mxu0 %v3328_v16  ;;  %3904 = vmatpush3.msra.mxu1 %v3364_v17  ;;  %v4827_v16 = vld [vmem:[%s6047_s3 + $0x238] sm:$0xff]  ;;  %v4834_v17 = vld [vmem:[%s6047_s3 + $0x230] sm:$0xff] }
  0xf6   :  { %590 = vmatprep.subr.mxu0 %v3327_v18  ;;  %3905 = vmatprep.subr.mxu1 %v6055_v1  ;;  %v3412_v18 = vld [vmem:[%s6046_s2 + $0x198] sm:$0xff] }
  0xf7   :  { %591 = vmatpush1.msra.mxu0 %v3326_v19  ;;  %3906 = vmatpush3.msra.mxu1 %v3363_v20  ;;  %v4843_v19 = vld [vmem:[%s6047_s3 + $0x228] sm:$0xff]  ;;  %v4850_v20 = vld [vmem:[%s6047_s3 + $0x220] sm:$0xff] }
  0xf8   :  { %592 = vmatprep.subr.mxu0 %v3325_v21  ;;  %3907 = vmatprep.subr.mxu1 %v6055_v1  ;;  %v3411_v21 = vld [vmem:[%s6046_s2 + $0x190] sm:$0xff] }
  0xf9   :  { %593 = vmatpush1.msra.mxu0 %v3324_v22  ;;  %3908 = vmatpush3.msra.mxu1 %v3362_v23  ;;  %v4859_v22 = vld [vmem:[%s6047_s3 + $0x218] sm:$0xff]  ;;  %v4866_v23 = vld [vmem:[%s6047_s3 + $0x210] sm:$0xff] }
  0xfa   :  { %594 = vmatprep.subr.mxu0 %v3323_v24  ;;  %3909 = vmatprep.subr.mxu1 %v6055_v1  ;;  %v3410_v24 = vld [vmem:[%s6046_s2 + $0x188] sm:$0xff] }
  0xfb   :  { %595 = vmatpush1.msra.mxu0 %v3322_v25  ;;  %3910 = vmatpush3.msra.mxu1 %v3361_v26  ;;  %v4875_v25 = vld [vmem:[%s6047_s3 + $0x208] sm:$0xff]  ;;  %v4882_v26 = vld [vmem:[%s6047_s3 + $0x200] sm:$0xff] }
  0xfc   :  { %596 = vmatprep.subr.mxu0 %v3321_v27  ;;  %3911 = vmatprep.subr.mxu1 %v6055_v1  ;;  %v3409_v27 = vld [vmem:[%s6046_s2 + $0x180] sm:$0xff] }
  0xfd   :  { %597 = vmatpush1.msra.mxu0 %v3320_v28  ;;  %3912 = vmatpush3.msra.mxu1 %v3360_v29  ;;  %v4893_v28 = vld [vmem:[%s6047_s3 + $0x2f8] sm:$0xff]  ;;  %v6051_v29 = vrot.slane %v4351_v32, 6 }
  0xfe   :  { %598 = vmatprep.subr.mxu0 %v4569_v30  ;;  %3913 = vmatprep.subr.mxu1 %v6055_v1  ;;  %6108 = vst [vmem:[#allocation5_spill] sm:$0xff] %v4893_v28 }
  0xff   :  { %599 = vmatpush1.msra.mxu0 %v4575_v31  ;;  %3914 = vmatpush3.msra.mxu1 %v3359_v33  ;;  %v4903_v33 = vld [vmem:[%s6047_s3 + $0x2f0] sm:$0xff] }
 0x100   :  { %600 = vmatprep.subr.mxu0 %v4583_v34  ;;  %3915 = vmatprep.subr.mxu1 %v6055_v1  ;;  %6109 = vst [vmem:[#allocation6_spill] sm:$0xff] %v4903_v33 }
 0x101   :  { %601 = vmatpush1.msra.mxu0 %v4590_v35  ;;  %3916 = vmatpush3.msra.mxu1 %v3358_v36  ;;  %v3442_v36 = vld [vmem:[%s6046_s2 + $0x1f8] sm:$0xff] }
 0x102   :  { %602 = vmatprep.subr.mxu0 %v4599_v37  ;;  %3917 = vmatprep.subr.mxu1 %v6055_v1 }
 0x103   :  { %603 = vmatpush1.msra.mxu0 %v4606_v38  ;;  %636 = vmatprep.mubr.f32.mxu0 %v6055_v1 }
 0x104   :  { %3918 = vmatpush3.msra.mxu1 %v3357_v39  ;;  %3919 = vmatprep.mubr.msk.f32.mxu1 %vm4199_vm1, %v6055_v1  ;;  %v4915_v39 = vld [vmem:[%s6047_s3 + $0x2e8] sm:$0xff] }
 0x105   :  { %3330 = vmatmul.mubr.msk.f32.vlgmr.msra.gmra.mxu0 %vm168_vm3, %v481_v52  ;;  %761 = vmatprep.subr.mxu0 %v4617_v40  ;;  %v3387_v52 = vld [vmem:[%s6046_s2 + $0x160] sm:$0xff]  ;;  %6110 = vst [vmem:[#allocation7_spill] sm:$0xff] %v4915_v39 }
 0x106   :  { %3920 = vmatmul.mubr.msk.f32.vlgmr.msra.gmra.mxu1 %vm168_vm3, %v827_v41  ;;  %3922 = vmatprep.subr.mxu1 %v6055_v1 }
 0x107   :  { %762 = vmatpush1.msra.mxu0 %v4627_v42  ;;  %3923 = vmatpush3.msra.mxu1 %v3390_v43  ;;  %v4924_v43 = vld [vmem:[%s6047_s3 + $0x2e0] sm:$0xff] }
 0x108   :  { %763 = vmatprep.subr.mxu0 %v4639_v44  ;;  %3924 = vmatprep.subr.mxu1 %v6055_v1  ;;  %6111 = vst [vmem:[#allocation8_spill] sm:$0xff] %v4924_v43 }
 0x109   :  { %764 = vmatpush1.msra.mxu0 %v4648_v45  ;;  %3925 = vmatpush3.msra.mxu1 %v3389_v46  ;;  %v4933_v46 = vld [vmem:[%s6047_s3 + $0x2d8] sm:$0xff] }
 0x10a   :  { %765 = vmatprep.subr.mxu0 %v4657_v47  ;;  %3926 = vmatprep.subr.mxu1 %v6055_v1  ;;  %6112 = vst [vmem:[#allocation9_spill] sm:$0xff] %v4933_v46 }
 0x10b   :  { %766 = vmatpush1.msra.mxu0 %v4664_v48  ;;  %3927 = vmatpush3.msra.mxu1 %v3388_v49  ;;  %v4940_v49 = vld [vmem:[%s6047_s3 + $0x2d0] sm:$0xff] }
 0x10c   :  { %767 = vmatprep.subr.mxu0 %v4673_v50  ;;  %3928 = vmatprep.subr.mxu1 %v6055_v1  ;;  %6113 = vst [vmem:[#allocation10_spill] sm:$0xff] %v4940_v49 }
 0x10d   :  { %768 = vmatpush1.msra.mxu0 %v4680_v51  ;;  %3929 = vmatpush3.msra.mxu1 %v3387_v52  ;;  %v3440_v52 = vld [vmem:[%s6046_s2 + $0x1e8] sm:$0xff] }
 0x10e   :  { %769 = vmatprep.subr.mxu0 %v4689_v53  ;;  %3930 = vmatprep.subr.mxu1 %v6055_v1 }
 0x10f   :  { %770 = vmatpush1.msra.mxu0 %v4696_v54  ;;  %3931 = vmatpush3.msra.mxu1 %v3386_v55  ;;  %v4949_v55 = vld [vmem:[%s6047_s3 + $0x2c8] sm:$0xff] }
 0x110   :  { %771 = vmatprep.subr.mxu0 %v4705_v56  ;;  %3932 = vmatprep.subr.mxu1 %v6055_v1  ;;  %6114 = vst [vmem:[#allocation11_spill] sm:$0xff] %v4949_v55 }
 0x111   :  { %772 = vmatpush1.msra.mxu0 %v4712_v57  ;;  %3933 = vmatpush3.msra.mxu1 %v3385_v58  ;;  %v4956_v58 = vld [vmem:[%s6047_s3 + $0x2c0] sm:$0xff] }
 0x112   :  { %773 = vmatprep.subr.mxu0 %v4721_v59  ;;  %3934 = vmatprep.subr.mxu1 %v6055_v1  ;;  %6115 = vst [vmem:[#allocation12_spill] sm:$0xff] %v4956_v58 }
 0x113   :  { %774 = vmatpush1.msra.mxu0 %v4728_v60  ;;  %3935 = vmatpush3.msra.mxu1 %v3384_v61  ;;  %v3439_v61 = vld [vmem:[%s6046_s2 + $0x1e0] sm:$0xff] }
 0x114   :  { %775 = vmatprep.subr.mxu0 %v4737_v62  ;;  %3936 = vmatprep.subr.mxu1 %v6055_v1 }
 0x115   :  { %776 = vmatpush1.msra.mxu0 %v4744_v63  ;;  %809 = vmatprep.mubr.f32.mxu0 %v6055_v1 }
 0x116   :  { %3937 = vmatpush3.msra.mxu1 %v3383_v0  ;;  %3938 = vmatprep.mubr.msk.f32.mxu1 %vm4199_vm1, %v6055_v1  ;;  %v4965_v0 = vld [vmem:[%s6047_s3 + $0x2b8] sm:$0xff] }
 0x117   :  { %3356 = vmatmul.mubr.msk.f32.vlgmr.msra.gmra.mxu0 %vm168_vm3, %v654_v15  ;;  %934 = vmatprep.subr.mxu0 %v4755_v2  ;;  %v3413_v15 = vld [vmem:[%s6046_s2 + $0x1a0] sm:$0xff]  ;;  %6116 = vst [vmem:[#allocation13_spill] sm:$0xff] %v4965_v0 }
 0x118   :  { %3939 = vmatmul.mubr.msk.f32.vlgmr.msra.gmra.mxu1 %vm168_vm3, %v1000_v3  ;;  %3941 = vmatprep.subr.mxu1 %v6055_v1 }
 0x119   :  { %935 = vmatpush1.msra.mxu0 %v4765_v4  ;;  %3942 = vmatpush3.msra.mxu1 %v3416_v5  ;;  %v4972_v5 = vld [vmem:[%s6047_s3 + $0x2b0] sm:$0xff] }
 0x11a   :  { %936 = vmatprep.subr.mxu0 %v4777_v6  ;;  %3943 = vmatprep.subr.mxu1 %v6055_v1  ;;  %6117 = vst [vmem:[#allocation14_spill] sm:$0xff] %v4972_v5 }
 0x11b   :  { %937 = vmatpush1.msra.mxu0 %v4786_v7  ;;  %3944 = vmatpush3.msra.mxu1 %v3415_v8  ;;  %v3438_v8 = vld [vmem:[%s6046_s2 + $0x1d8] sm:$0xff] }
 0x11c   :  { %938 = vmatprep.subr.mxu0 %v4795_v9  ;;  %3945 = vmatprep.subr.mxu1 %v6055_v1 }
 0x11d   :  { %939 = vmatpush1.msra.mxu0 %v4802_v10  ;;  %3946 = vmatpush3.msra.mxu1 %v3414_v11  ;;  %v4981_v11 = vld [vmem:[%s6047_s3 + $0x2a8] sm:$0xff] }
 0x11e   :  { %940 = vmatprep.subr.mxu0 %v4811_v12  ;;  %3947 = vmatprep.subr.mxu1 %v6055_v1  ;;  %6118 = vst [vmem:[#allocation15_spill] sm:$0xff] %v4981_v11 }
 0x11f   :  { %941 = vmatpush1.msra.mxu0 %v4818_v13  ;;  %3948 = vmatpush3.msra.mxu1 %v3413_v15  ;;  %v4988_v15 = vld [vmem:[%s6047_s3 + $0x2a0] sm:$0xff] }
 0x120   :  { %942 = vmatprep.subr.mxu0 %v4827_v16  ;;  %3949 = vmatprep.subr.mxu1 %v6055_v1  ;;  %6119 = vst [vmem:[#allocation16_spill] sm:$0xff] %v4988_v15 }
 0x121   :  { %943 = vmatpush1.msra.mxu0 %v4834_v17  ;;  %3950 = vmatpush3.msra.mxu1 %v3412_v18  ;;  %v3437_v18 = vld [vmem:[%s6046_s2 + $0x1d0] sm:$0xff] }
 0x122   :  { %944 = vmatprep.subr.mxu0 %v4843_v19  ;;  %3951 = vmatprep.subr.mxu1 %v6055_v1 }
 0x123   :  { %945 = vmatpush1.msra.mxu0 %v4850_v20  ;;  %3952 = vmatpush3.msra.mxu1 %v3411_v21  ;;  %v4997_v21 = vld [vmem:[%s6047_s3 + $0x298] sm:$0xff] }
 0x124   :  { %946 = vmatprep.subr.mxu0 %v4859_v22  ;;  %3953 = vmatprep.subr.mxu1 %v6055_v1  ;;  %6120 = vst [vmem:[#allocation17_spill] sm:$0xff] %v4997_v21 }
 0x125   :  { %947 = vmatpush1.msra.mxu0 %v4866_v23  ;;  %3954 = vmatpush3.msra.mxu1 %v3410_v24  ;;  %v5004_v24 = vld [vmem:[%s6047_s3 + $0x290] sm:$0xff] }
 0x126   :  { %948 = vmatprep.subr.mxu0 %v4875_v25  ;;  %3955 = vmatprep.subr.mxu1 %v6055_v1  ;;  %6121 = vst [vmem:[#allocation18_spill] sm:$0xff] %v5004_v24 }
 0x127   :  { %949 = vmatpush1.msra.mxu0 %v4882_v26  ;;  %982 = vmatprep.mubr.f32.mxu0 %v6055_v1 }
 0x128   :  { %3956 = vmatpush3.msra.mxu1 %v3409_v27  ;;  %3957 = vmatprep.mubr.msk.f32.mxu1 %vm4199_vm1, %v6055_v1  ;;  %v3436_v27 = vld [vmem:[%s6046_s2 + $0x1c8] sm:$0xff] }
 0x129   :  { %3382 = vmatmul.mubr.msk.f32.vlgmr.msra.gmra.mxu0 %vm168_vm3, %v827_v41  ;;  %1107 = vmatprep.subr.mxu0 %v4893_v28  ;;  %v3441_v41 = vld [vmem:[%s6046_s2 + $0x1f0] sm:$0xff] }
 0x12a   :  { %3958 = vmatmul.mubr.msk.f32.vlgmr.msra.gmra.mxu1 %vm168_vm3, %v6051_v29  ;;  %3960 = vmatprep.subr.mxu1 %v6055_v1  ;;  %v5064_v29 = vld [vmem:[%s6047_s3 + $0x358] sm:$0xff] }
 0x12b   :  { %1108 = vmatpush1.msra.mxu0 %v4903_v33  ;;  %3961 = vmatpush3.msra.mxu1 %v3442_v36  ;;  %v5013_v36 = vld [vmem:[%s6047_s3 + $0x288] sm:$0xff]  ;;  %6128 = vst [vmem:[#allocation25_spill] sm:$0xff] %v5064_v29 }
 0x12c   :  { %1109 = vmatprep.subr.mxu0 %v4915_v39  ;;  %3962 = vmatprep.subr.mxu1 %v6055_v1  ;;  %6122 = vst [vmem:[#allocation19_spill] sm:$0xff] %v5013_v36 }
 0x12d   :  { %1110 = vmatpush1.msra.mxu0 %v4924_v43  ;;  %3963 = vmatpush3.msra.mxu1 %v3441_v41  ;;  %v5020_v41 = vld [vmem:[%s6047_s3 + $0x280] sm:$0xff] }
 0x12e   :  { %1111 = vmatprep.subr.mxu0 %v4933_v46  ;;  %3964 = vmatprep.subr.mxu1 %v6055_v1  ;;  %6123 = vst [vmem:[#allocation20_spill] sm:$0xff] %v5020_v41 }
 0x12f   :  { %1112 = vmatpush1.msra.mxu0 %v4940_v49  ;;  %3965 = vmatpush3.msra.mxu1 %v3440_v52  ;;  %v3435_v52 = vld [vmem:[%s6046_s2 + $0x1c0] sm:$0xff] }
 0x130   :  { %1113 = vmatprep.subr.mxu0 %v4949_v55  ;;  %3966 = vmatprep.subr.mxu1 %v6055_v1 }
 0x131   :  { %1114 = vmatpush1.msra.mxu0 %v4956_v58  ;;  %3967 = vmatpush3.msra.mxu1 %v3439_v61  ;;  %v5031_v61 = vld [vmem:[%s6047_s3 + $0x378] sm:$0xff] }
 0x132   :  { %1115 = vmatprep.subr.mxu0 %v4965_v0  ;;  %3968 = vmatprep.subr.mxu1 %v6055_v1  ;;  %6124 = vst [vmem:[#allocation21_spill] sm:$0xff] %v5031_v61 }
 0x133   :  { %1116 = vmatpush1.msra.mxu0 %v4972_v5  ;;  %3969 = vmatpush3.msra.mxu1 %v3438_v8  ;;  %v5038_v8 = vld [vmem:[%s6047_s3 + $0x370] sm:$0xff] }
 0x134   :  { %1117 = vmatprep.subr.mxu0 %v4981_v11  ;;  %3970 = vmatprep.subr.mxu1 %v6055_v1  ;;  %6125 = vst [vmem:[#allocation22_spill] sm:$0xff] %v5038_v8 }
 0x135   :  { %1118 = vmatpush1.msra.mxu0 %v4988_v15  ;;  %3971 = vmatpush3.msra.mxu1 %v3437_v18  ;;  %v6052_v18 = vrot.slane %v4351_v32, 7 }
 0x136   :  { %1119 = vmatprep.subr.mxu0 %v4997_v21  ;;  %3972 = vmatprep.subr.mxu1 %v6055_v1  ;;  %v3474_v21 = vld [vmem:[%s6046_s2 + $0x58] sm:$0xff] }
 0x137   :  { %1120 = vmatpush1.msra.mxu0 %v5004_v24  ;;  %3973 = vmatpush3.msra.mxu1 %v3436_v27  ;;  %v5046_v27 = vld [vmem:[%s6047_s3 + $0x368] sm:$0xff] }
 0x138   :  { %1121 = vmatprep.subr.mxu0 %v5013_v36  ;;  %3974 = vmatprep.subr.mxu1 %v6055_v1  ;;  %6126 = vst [vmem:[#allocation23_spill] sm:$0xff] %v5046_v27 }
 0x139   :  { %1122 = vmatpush1.msra.mxu0 %v5020_v41  ;;  %1155 = vmatprep.mubr.f32.mxu0 %v6055_v1  ;;  %v3475_v41 = vld [vmem:[%s6046_s2 + $0x60] sm:$0xff] }
 0x13a   :  { %3975 = vmatpush3.msra.mxu1 %v3435_v52  ;;  %3976 = vmatprep.mubr.msk.f32.mxu1 %vm4199_vm1, %v6055_v1  ;;  %v5055_v52 = vld [vmem:[%s6047_s3 + $0x360] sm:$0xff] }
 0x13b   :  { %3408 = vmatmul.mubr.msk.f32.vlgmr.msra.gmra.mxu0 %vm168_vm3, %v1000_v3  ;;  %1280 = vmatprep.subr.mxu0 %v5031_v61  ;;  %6127 = vst [vmem:[#allocation24_spill] sm:$0xff] %v5055_v52  ;;  %v5070_v3 = vld [vmem:[%s6047_s3 + $0x350] sm:$0xff] }
 0x13c   :  { %3977 = vmatmul.mubr.msk.f32.vlgmr.msra.gmra.mxu1 %vm168_vm3, %v6052_v18  ;;  %1281 = vmatpush1.msra.mxu0 %v5038_v8  ;;  %6129 = vst [vmem:[#allocation26_spill] sm:$0xff] %v5070_v3  ;;  %v5077_v18 = vld [vmem:[%s6047_s3 + $0x348] sm:$0xff]  ;;  %v6146_v8 = vmov 0.0  }
 0x13d   :  { %1282 = vmatprep.subr.mxu0 %v5046_v27  ;;  %1328 = vmatprep.mubr.f32.mxu0 %v6055_v1  ;;  %6130 = vst [vmem:[#allocation27_spill] sm:$0xff] %v5077_v18  ;;  %v5084_v27 = vld [vmem:[%s6047_s3 + $0x340] sm:$0xff] }
 0x13e   :  { %1283 = vmatpush1.msra.mxu0 %v5055_v52  ;;  %1581 = vmatprep.mubr.f32.mxu1 %v6055_v1  ;;  %6131 = vst [vmem:[#allocation28_spill] sm:$0xff] %v5084_v27  ;;  %v5090_v52 = vld [vmem:[%s6047_s3 + $0x338] sm:$0xff]  ;;  %v5096_v1 = vld [vmem:[%s6047_s3 + $0x330] sm:$0xff] }
 0x13f   :  { %1284 = vmatprep.subr.mxu0 %v5064_v29  ;;  %6132 = vst [vmem:[#allocation29_spill] sm:$0xff] %v5090_v52  ;;  %6133 = vst [vmem:[#allocation30_spill] sm:$0xff] %v5096_v1  ;;  %v5102_v29 = vld [vmem:[%s6047_s3 + $0x328] sm:$0xff] }
 0x140   :  { %1285 = vmatpush1.msra.mxu0 %v5070_v3  ;;  %6134 = vst [vmem:[#allocation31_spill] sm:$0xff] %v5102_v29  ;;  %v5108_v3 = vld [vmem:[%s6047_s3 + $0x320] sm:$0xff] }
 0x141   :  { %1286 = vmatprep.subr.mxu0 %v5077_v18  ;;  %6135 = vst [vmem:[#allocation32_spill] sm:$0xff] %v5108_v3  ;;  %v5114_v18 = vld [vmem:[%s6047_s3 + $0x318] sm:$0xff] }
 0x142   :  { %1287 = vmatpush1.msra.mxu0 %v5084_v27  ;;  %6136 = vst [vmem:[#allocation33_spill] sm:$0xff] %v5114_v18  ;;  %v5120_v27 = vld [vmem:[%s6047_s3 + $0x310] sm:$0xff] }
 0x143   :  { %1288 = vmatprep.subr.mxu0 %v5090_v52  ;;  %6137 = vst [vmem:[#allocation34_spill] sm:$0xff] %v5120_v27  ;;  %v5126_v52 = vld [vmem:[%s6047_s3 + $0x308] sm:$0xff] }
 0x144   :  { %1289 = vmatpush1.msra.mxu0 %v5096_v1  ;;  %6138 = vst [vmem:[#allocation35_spill] sm:$0xff] %v5126_v52  ;;  %v5132_v1 = vld [vmem:[%s6047_s3 + $0x300] sm:$0xff] }
 0x145   :  { %1290 = vmatprep.subr.mxu0 %v5102_v29  ;;  %6139 = vst [vmem:[#allocation36_spill] sm:$0xff] %v5132_v1  ;;  %v5138_v29 = vld [vmem:[%s6047_s3 + $0x3f8] sm:$0xff] }
 0x146   :  { %1291 = vmatpush1.msra.mxu0 %v5108_v3  ;;  %6140 = vst [vmem:[#allocation37_spill] sm:$0xff] %v5138_v29  ;;  %v5144_v3 = vld [vmem:[%s6047_s3 + $0x3f0] sm:$0xff] }
 0x147   :  { %1292 = vmatprep.subr.mxu0 %v5114_v18  ;;  %6141 = vst [vmem:[#allocation38_spill] sm:$0xff] %v5144_v3  ;;  %v5150_v18 = vld [vmem:[%s6047_s3 + $0x3e8] sm:$0xff] }
 0x148   :  { %1293 = vmatpush1.msra.mxu0 %v5120_v27  ;;  %6142 = vst [vmem:[#allocation39_spill] sm:$0xff] %v5150_v18  ;;  %v6143_v27 = vrot.slane %v4351_v32, 6 }
 0x149   :  { %1294 = vmatprep.subr.mxu0 %v5126_v52  ;;  %v5159_v52 = vld [vmem:[%s6047_s3 + $0x3e0] sm:$0xff] }
 0x14a   :  { %1295 = vmatpush1.msra.mxu0 %v5132_v1  ;;  %6144 = vst [vmem:[#allocation40_spill] sm:$0xff] %v5159_v52  ;;  %v5165_v1 = vld [vmem:[%s6047_s3 + $0x3d8] sm:$0xff] }
 0x14b   :  { %3434 = vmatmul.mubr.msk.f32.vlgmr.msra.gmra.mxu0 %vm168_vm3, %v6143_v27  ;;  %1453 = vmatprep.subr.mxu0 %v5138_v29  ;;  %6145 = vst [vmem:[#allocation41_spill] sm:$0xff] %v5165_v1  ;;  %v5172_v27 = vld [vmem:[%s6047_s3 + $0x3d0] sm:$0xff]  ;;  %v5184_v29 = vld [vmem:[%s6047_s3 + $0x3c0] sm:$0xff] }
 0x14c   :  { %1454 = vmatpush1.msra.mxu0 %v5144_v3  ;;  %1501 = vmatprep.mubr.f32.mxu0 %v6146_v8  ;;  %6147 = vst [vmem:[#allocation42_spill] sm:$0xff] %v5172_v27  ;;  %v5178_v3 = vld [vmem:[%s6047_s3 + $0x3c8] sm:$0xff]  ;;  %6149 = vst [vmem:[#allocation44_spill] sm:$0xff] %v5184_v29 }
 0x14d   :  { %1455 = vmatprep.subr.mxu0 %v5150_v18  ;;  %6148 = vst [vmem:[#allocation43_spill] sm:$0xff] %v5178_v3  ;;  %v5190_v18 = vld [vmem:[%s6047_s3 + $0x3b8] sm:$0xff] }
 0x14e   :  { %1456 = vmatpush1.msra.mxu0 %v5159_v52  ;;  %6150 = vst [vmem:[#allocation45_spill] sm:$0xff] %v5190_v18  ;;  %v5196_v52 = vld [vmem:[%s6047_s3 + $0x3b0] sm:$0xff] }
 0x14f   :  { %1457 = vmatprep.subr.mxu0 %v5165_v1  ;;  %6151 = vst [vmem:[#allocation46_spill] sm:$0xff] %v5196_v52  ;;  %v5202_v1 = vld [vmem:[%s6047_s3 + $0x3a8] sm:$0xff] }
 0x150   :  { %1458 = vmatpush1.msra.mxu0 %v5172_v27  ;;  %6152 = vst [vmem:[#allocation47_spill] sm:$0xff] %v5202_v1  ;;  %v5208_v27 = vld [vmem:[%s6047_s3 + $0x3a0] sm:$0xff] }
 0x151   :  { %1459 = vmatprep.subr.mxu0 %v5178_v3  ;;  %6153 = vst [vmem:[#allocation48_spill] sm:$0xff] %v5208_v27  ;;  %v5214_v3 = vld [vmem:[%s6047_s3 + $0x398] sm:$0xff] }
 0x152   :  { %1460 = vmatpush1.msra.mxu0 %v5184_v29  ;;  %6154 = vst [vmem:[#allocation49_spill] sm:$0xff] %v5214_v3  ;;  %v5220_v29 = vld [vmem:[%s6047_s3 + $0x390] sm:$0xff] }
 0x153   :  { %1461 = vmatprep.subr.mxu0 %v5190_v18  ;;  %6155 = vst [vmem:[#allocation50_spill] sm:$0xff] %v5220_v29  ;;  %v5226_v18 = vld [vmem:[%s6047_s3 + $0x388] sm:$0xff] }
 0x154   :  { %1462 = vmatpush1.msra.mxu0 %v5196_v52  ;;  %6156 = vst [vmem:[#allocation51_spill] sm:$0xff] %v5226_v18  ;;  %v5232_v52 = vld [vmem:[%s6047_s3 + $0x380] sm:$0xff] }
 0x155   :  { %1463 = vmatprep.subr.mxu0 %v5202_v1  ;;  %6157 = vst [vmem:[#allocation52_spill] sm:$0xff] %v5232_v52  ;;  %v6158_v1 = vrot.slane %v4351_v32, 7  ;;  %v3464_v32 = vld [vmem:[%s6045_s1 + $0x28] sm:$0xff] }
 0x156   :  { %1464 = vmatpush1.msra.mxu0 %v5208_v27  ;;  %v3468_v27 = vld [vmem:[%s6045_s1 + $0x48] sm:$0x1f] }
 0x157   :  { %1465 = vmatprep.subr.mxu0 %v5214_v3  ;;  %v3467_v3 = vld [vmem:[%s6045_s1 + $0x40] sm:$0xff] }
 0x158   :  { %1466 = vmatpush1.msra.mxu0 %v5220_v29 }
 0x159   :  { %1467 = vmatprep.subr.mxu0 %v5226_v18 }
 0x15a   :  { %1468 = vmatpush1.msra.mxu0 %v5232_v52  ;;  %v3466_v52 = vld [vmem:[%s6045_s1 + $0x38] sm:$0xff] }
 0x15b   :  { %3460 = vmatmul.mubr.msk.f32.vlgmr.msra.gmra.mxu0 %vm168_vm3, %v6158_v1  ;;  %3979 = vmatprep.subr.mxu0 %v6146_v8  ;;  %v3465_v1 = vld [vmem:[%s6045_s1 + $0x30] sm:$0xff] }
 0x15c   :  { %3980 = vmatpush3.msk.msra.mxu0 %vm58_vm0, %v3468_v27  ;;  %3989 = vmatprep.mubr.msk.f32.mxu0 %vm4199_vm1, %v6146_v8  ;;  %v26_v27 = vld [vmem:[%s6048_s4 + $0x8] sm:$0xff] }
 0x15d   :  { %3981 = vmatprep.subr.mxu0 %v6146_v8 }
 0x15e   :  { %3982 = vmatpush3.msra.mxu0 %v3467_v3  ;;  %v27_v3 = vld [vmem:[%s6048_s4 + $0x10] sm:$0xff] }
 0x15f   :  { %3983 = vmatprep.subr.mxu0 %v6146_v8 }
 0x160   :  { %3984 = vmatpush3.msra.mxu0 %v3466_v52  ;;  %v28_v52 = vld [vmem:[%s6048_s4 + $0x18] sm:$0xff] }
 0x161   :  { %3985 = vmatprep.subr.mxu0 %v6146_v8  ;;  %1545 = vmatprep.subr.mxu1 %v28_v52 }
 0x162   :  { %3986 = vmatpush3.msra.mxu0 %v3465_v1  ;;  %1546 = vmatpush1.msra.mxu1 %v27_v3  ;;  %v3478_v3 = vld [vmem:[%s6046_s2 + $0x78] sm:$0xff] }
 0x163   :  { %3987 = vmatprep.subr.mxu0 %v6146_v8  ;;  %1547 = vmatprep.subr.mxu1 %v26_v27  ;;  %v3477_v27 = vld [vmem:[%s6046_s2 + $0x70] sm:$0xff] }
 0x164   :  { %3988 = vmatpush3.msra.mxu0 %v3464_v32 }
 0x165   :  { %3990 = vmatmul.mubr.msk.f32.vlgmr.msra.gmra.mxu0 %vm54_vm2, %v4286_v14  ;;  %3992 = vmatprep.subr.mxu0 %v6146_v8  ;;  %v5280_v14 = vld [vmem:[%s6048_s4] sm:$0xff] }
 0x166   :  { %4008 = vmatprep.mubr.msk.f32.mxu0 %vm4199_vm1, %v6146_v8  ;;  %6159 = vst [vmem:[#allocation53_spill] sm:$0xff] %v5280_v14  ;;  %1548 = vmatpush1.msra.mxu1 %v5280_v14  ;;  %v3476_v14 = vld [vmem:[%s6046_s2 + $0x68] sm:$0xff] }
 0x167   :  { %1594 = vmatprep.subr.mxu1 %v6146_v8  ;;  %3993 = vmatpush3.msra.mxu0 %v3478_v3 }
 0x168   :  { %3994 = vmatprep.subr.mxu0 %v6146_v8 }
 0x169   :  { %3995 = vmatpush3.msra.mxu0 %v3477_v27 }
 0x16a   :  { %3996 = vmatprep.subr.mxu0 %v6146_v8 }
 0x16b   :  { %3997 = vmatpush3.msra.mxu0 %v3476_v14 }
 0x16c   :  { %3998 = vmatprep.subr.mxu0 %v6146_v8 }
 0x16d   :  { %3999 = vmatpush3.msra.mxu0 %v3475_v41 }
 0x16e   :  { %4000 = vmatprep.subr.mxu0 %v6146_v8 }
 0x16f   :  { %4001 = vmatpush3.msra.mxu0 %v3474_v21 }
 0x170   :  { %4002 = vmatprep.subr.mxu0 %v6146_v8 }
 0x190   :  { %v237_v1 = vpop.f32.mrf.mxu0  ;;  %v396_v52 = vpop.f32.mrf.mxu1 }
 0x192   :  { %v3845_v32 = vpop.f32.mrf.mxu0  ;;  %v398_v18 = vpop.f32.mrf.mxu1 }
 0x1a1   :  { %v309_v29 = vpop.f32.mrf.mxu0 }
 0x1a2   :  { %v310_v32 = vadd.f32 %v309_v29, %v237_v1  ;;  %v550_v61 = vpop.f32.mrf.mxu1  ;;  %v3473_v29 = vld [vmem:[%s6046_s2 + $0x50] sm:$0xff] }
 0x1a3   :  { %v3864_v36 = vpop.f32.mrf.mxu0  ;;  %4003 = vmatpush3.msra.mxu0 %v3473_v29 }
 0x1a4   :  { %v554_v3 = vadd.f32 %v550_v61, %v310_v32  ;;  %v3883_v24 = vpop.f32.mrf.mxu1  ;;  %4004 = vmatprep.subr.mxu0 %v6146_v8  ;;  %v3471_v36 = vld [vmem:[%s6046_s2 + $0x40] sm:$0xff] }
 0x1a5   :  { %v3472_v24 = vld [vmem:[%s6046_s2 + $0x48] sm:$0xff] }
 0x1a6   :  { %4005 = vmatpush3.msra.mxu0 %v3472_v24 }
 0x1a7   :  { %4006 = vmatprep.subr.mxu0 %v6146_v8 }
 0x1a8   :  { %4007 = vmatpush3.msra.mxu0 %v3471_v36 }
 0x1a9   :  { %4011 = vmatprep.subr.mxu0 %v6146_v8 }
 0x1b3   :  { %v467_v21 = vpop.f32.mrf.mxu0 }
 0x1b4   :  { %v468_v41 = vadd.f32 %v467_v21, %v396_v52  ;;  %v723_v61 = vpop.f32.mrf.mxu1 }
 0x1b5   :  { %v727_v14 = vadd.f32 %v723_v61, %v554_v3  ;;  %v469_v1 = vpop.f32.mrf.mxu0 }
 0x1b6   :  { %v470_v27 = vadd.f32 %v469_v1, %v398_v18  ;;  %v3902_v32 = vpop.f32.mrf.mxu1 }
 0x1c5   :  { %v638_v29 = vpop.f32.mrf.mxu0 }
 0x1c6   :  { %v643_v15 = vadd.f32 %v638_v29, %v468_v41  ;;  %v896_v11 = vpop.f32.mrf.mxu1 }
 0x1c7   :  { %v640_v5 = vpop.f32.mrf.mxu0  ;;  %v900_v18 = vadd.f32 %v896_v11, %v727_v14 }
 0x1c8   :  { %v644_v0 = vadd.f32 %v640_v5, %v470_v27  ;;  %v3921_v58 = vpop.f32.mrf.mxu1 }
 0x1d7   :  { %v811_v55 = vpop.f32.mrf.mxu0 }
 0x1d8   :  { %v816_v24 = vadd.f32 %v811_v55, %v643_v15  ;;  %v1069_v49 = vpop.f32.mrf.mxu1  ;;  %v5361_v15 = vld [vmem:[%s6049_s5 + $0x48] sm:$0xff] }
 0x1d9   :  { %v813_v46 = vpop.f32.mrf.mxu0  ;;  %v1073_v1 = vadd.f32 %v1069_v49, %v900_v18  ;;  %v5347_v49 = vld [vmem:[%s6049_s5 + $0x58] sm:$0xff]  ;;  %v5396_v18 = vld [vmem:[%s6049_s5 + $0x20] sm:$0xff] }
 0x1da   :  { %v817_v36 = vadd.f32 %v813_v46, %v644_v0  ;;  %v3940_v43 = vpop.f32.mrf.mxu1  ;;  %v5340_v46 = vld [vmem:[%s6049_s5 + $0x60] sm:$0xff]  ;;  %v5354_v0 = vld [vmem:[%s6049_s5 + $0x50] sm:$0xff] }
 0x1e9   :  { %v984_v39 = vpop.f32.mrf.mxu0 }
 0x1ea   :  { %v989_v33 = vadd.f32 %v984_v39, %v816_v24  ;;  %v1242_v52 = vpop.f32.mrf.mxu1  ;;  %v5319_v39 = vld [vmem:[%s6049_s5 + $0x78] sm:$0xff] }
 0x1eb   :  { %v986_v21 = vpop.f32.mrf.mxu0  ;;  %v1246_v32 = vadd.f32 %v1242_v52, %v1073_v1  ;;  %v5403_v1 = vld [vmem:[%s6049_s5 + $0x18] sm:$0xff] }
 0x1ec   :  { %v990_v3 = vadd.f32 %v986_v21, %v817_v36  ;;  %v3959_v61 = vpop.f32.mrf.mxu1  ;;  %v5368_v36 = vld [vmem:[%s6049_s5 + $0x40] sm:$0xff]  ;;  %v5375_v21 = vld [vmem:[%s6049_s5 + $0x38] sm:$0xff] }
 0x1ed   :  { %v5389_v61 = vld [vmem:[%s6049_s5 + $0x28] sm:$0xff] }
 0x1fb   :  { %v1157_v41 = vpop.f32.mrf.mxu0 }
 0x1fc   :  { %v1162_v29 = vadd.f32 %v1157_v41, %v989_v33  ;;  %v1415_v28 = vpop.f32.mrf.mxu1  ;;  %v5326_v33 = vld [vmem:[%s6049_s5 + $0x70] sm:$0xff] }
 0x1fd   :  { %v1419_v5 = vadd.f32 %v1415_v28, %v1246_v32  ;;  %v1159_v58 = vpop.f32.mrf.mxu0  ;;  %v5333_v28 = vld [vmem:[%s6049_s5 + $0x68] sm:$0xff]  ;;  %v5410_v32 = vld [vmem:[%s6049_s5 + $0x10] sm:$0xff] }
 0x1fe   :  { %v1163_v27 = vadd.f32 %v1159_v58, %v990_v3  ;;  %v3978_v55 = vpop.f32.mrf.mxu1  ;;  %v5382_v3 = vld [vmem:[%s6049_s5 + $0x30] sm:$0xff] }
 0x1ff   :  { %vm1510_vm5 = vcmp.ge.f32.partialorder %v1419_v5, 0.0 }
 0x200   :  { %v3461_v43 = vsel %vm1510_vm5, 1.0, %v6146_v8 }
 0x201   :  { %3462 = vmatmul.mubr.msk.f32.vlgmr.msra.gmra.mxu1 %vm1513_vm4, %v3461_v43  ;;  %v5435_v43 = vld [vmem:[%s6049_s5 + $0x98] sm:$0xff] }
 0x202   :  { %1595 = vmatpush1.msra.mxu1 %v5319_v39 }
 0x203   :  { %1596 = vmatprep.subr.mxu1 %v6146_v8 }
 0x204   :  { %1597 = vmatpush1.msra.mxu1 %v5326_v33 }
 0x205   :  { %1598 = vmatprep.subr.mxu1 %v6146_v8 }
 0x206   :  { %1599 = vmatpush1.msra.mxu1 %v5333_v28 }
 0x207   :  { %1600 = vmatprep.subr.mxu1 %v6146_v8 }
 0x208   :  { %1601 = vmatpush1.msra.mxu1 %v5340_v46 }
 0x209   :  { %1602 = vmatprep.subr.mxu1 %v6146_v8 }
 0x20a   :  { %1603 = vmatpush1.msra.mxu1 %v5347_v49 }
 0x20b   :  { %v1330_v11 = vpop.f32.mrf.mxu0  ;;  %1604 = vmatprep.subr.mxu1 %v6146_v8 }
 0x20c   :  { %v1335_v14 = vadd.f32 %v1330_v11, %v1162_v29  ;;  %1605 = vmatpush1.msra.mxu1 %v5354_v0  ;;  %v5417_v29 = vld [vmem:[%s6049_s5 + $0x8] sm:$0xff] }
 0x20d   :  { %v1332_v24 = vpop.f32.mrf.mxu0  ;;  %1606 = vmatprep.subr.mxu1 %v6146_v8 }
 0x20e   :  { %v1336_v52 = vadd.f32 %v1332_v24, %v1163_v27  ;;  %1607 = vmatpush1.msra.mxu1 %v5361_v15  ;;  %v5426_v27 = vld [vmem:[%s6049_s5] sm:$0xff] }
 0x20f   :  { %1608 = vmatprep.subr.mxu1 %v6146_v8 }
 0x210   :  { %1609 = vmatpush1.msra.mxu1 %v5368_v36 }
 0x211   :  { %1610 = vmatprep.subr.mxu1 %v6146_v8 }
 0x212   :  { %1611 = vmatpush1.msra.mxu1 %v5375_v21 }
 0x213   :  { %1612 = vmatprep.subr.mxu1 %v6146_v8 }
 0x214   :  { %1613 = vmatpush1.msra.mxu1 %v5382_v3 }
 0x215   :  { %1614 = vmatprep.subr.mxu1 %v6146_v8 }
 0x216   :  { %1615 = vmatpush1.msra.mxu1 %v5389_v61 }
 0x217   :  { %1616 = vmatprep.subr.mxu1 %v6146_v8 }
 0x218   :  { %1617 = vmatpush1.msra.mxu1 %v5396_v18 }
 0x219   :  { %1618 = vmatprep.subr.mxu1 %v6146_v8 }
 0x21a   :  { %1619 = vmatpush1.msra.mxu1 %v5403_v1 }
 0x21b   :  { %v1503_v41 = vpop.f32.mrf.mxu0  ;;  %1620 = vmatprep.subr.mxu1 %v6146_v8 }
 0x21c   :  { %v5419_v5 = vadd.f32 %v1503_v41, %v1335_v14  ;;  %1621 = vmatpush1.msra.mxu1 %v5410_v32  ;;  %v1753_v41 = vld [vmem:[%s6046_s2 + $0x38] sm:$0xff] }
 0x21d   :  { %v1505_v58 = vpop.f32.mrf.mxu0  ;;  %1622 = vmatprep.subr.mxu1 %v6146_v8 }
 0x21e   :  { %v5428_v55 = vadd.f32 %v1505_v58, %v1336_v52  ;;  %1623 = vmatpush1.msra.mxu1 %v5417_v29  ;;  %v1752_v58 = vld [vmem:[%s6046_s2 + $0x30] sm:$0xff] }
 0x21f   :  { %1624 = vmatprep.subr.mxu1 %v6146_v8 }
 0x220   :  { %1625 = vmatpush1.msra.mxu1 %v5426_v27 }
 0x221   :  { %1650 = vmatprep.subr.mxu1 %v6146_v8 }
 0x222   :  { %1651 = vmatpush2.msra.mxu1 %v5435_v43 }
 0x223   :  { %1652 = vmatprep.subr.mxu1 %v6146_v8 }
 0x225   :  { %v1741_v11 = vpop.f32.mrf.mxu0 }
 0x226   :  { %v5441_v14 = vmax.f32 %v1741_v11, 0.0  ;;  %v1751_v11 = vld [vmem:[%s6046_s2 + $0x28] sm:$0xff] }
 0x227   :  { %v3991_v24 = vpop.f32.mrf.mxu0 }
 0x228   :  { %v6104_v52 = vrot.slane %v5441_v14, 1  ;;  %v1750_v24 = vld [vmem:[%s6046_s2 + $0x20] sm:$0xff] }
 0x22a   :  { %4009 = vmatmul.mubr.msk.f32.vlgmr.msra.gmra.mxu0 %vm168_vm3, %v6104_v52  ;;  %v4153_v52 = vld [vmem:[%s6047_s3 + $0x48] sm:$0xff] }
 0x22b   :  { %4012 = vmatpush3.msra.mxu0 %v1753_v41  ;;  %4027 = vmatprep.mubr.msk.f32.mxu0 %vm4199_vm1, %v6146_v8  ;;  %v1749_v41 = vld [vmem:[%s6046_s2 + $0x18] sm:$0xff] }
 0x22c   :  { %4013 = vmatprep.subr.mxu0 %v6146_v8 }
 0x22d   :  { %4014 = vmatpush3.msra.mxu0 %v1752_v58  ;;  %v1748_v58 = vld [vmem:[%s6046_s2 + $0x10] sm:$0xff] }
 0x22e   :  { %4015 = vmatprep.subr.mxu0 %v6146_v8 }
 0x22f   :  { %4016 = vmatpush3.msra.mxu0 %v1751_v11  ;;  %v1747_v11 = vld [vmem:[%s6046_s2 + $0x8] sm:$0xff] }
 0x230   :  { %4017 = vmatprep.subr.mxu0 %v6146_v8 }
 0x231   :  { %4018 = vmatpush3.msra.mxu0 %v1750_v24  ;;  %v1746_v24 = vld [vmem:[%s6046_s2] sm:$0xff] }
 0x232   :  { %4019 = vmatprep.subr.mxu0 %v6146_v8 }
 0x233   :  { %4020 = vmatpush3.msra.mxu0 %v1749_v41  ;;  %v4147_v41 = vld [vmem:[%s6047_s3 + $0x78] sm:$0xff] }
 0x234   :  { %4021 = vmatprep.subr.mxu0 %v6146_v8 }
 0x235   :  { %4022 = vmatpush3.msra.mxu0 %v1748_v58  ;;  %v4148_v58 = vld [vmem:[%s6047_s3 + $0x70] sm:$0xff] }
 0x236   :  { %4023 = vmatprep.subr.mxu0 %v6146_v8 }
 0x237   :  { %4024 = vmatpush3.msra.mxu0 %v1747_v11  ;;  %v4149_v11 = vld [vmem:[%s6047_s3 + $0x68] sm:$0xff] }
 0x238   :  { %4025 = vmatprep.subr.mxu0 %v6146_v8 }
 0x239   :  { %4026 = vmatpush3.msra.mxu0 %v1746_v24  ;;  %v4150_v24 = vld [vmem:[%s6047_s3 + $0x60] sm:$0xff] }
 0x23a   :  { %2027 = vmatprep.subr.mxu0 %v4147_v41  ;;  %4028 = vmatmul.mubr.msk.f32.vlgmr.msra.gmra.mxu0 %vm168_vm3, %v5441_v14  ;;  %v4151_v41 = vld [vmem:[%s6047_s3 + $0x58] sm:$0xff] }
 0x23b   :  { %2028 = vmatpush1.msra.mxu0 %v4148_v58  ;;  %2075 = vmatprep.mubr.f32.mxu0 %v6146_v8  ;;  %v4152_v58 = vld [vmem:[%s6047_s3 + $0x50] sm:$0xff] }
 0x23c   :  { %2029 = vmatprep.subr.mxu0 %v4149_v11  ;;  %v5507_v11 = vld [vmem:[%s6049_s5 + $0x90] sm:$0xff] }
 0x23d   :  { %2030 = vmatpush1.msra.mxu0 %v4150_v24  ;;  %6160 = vst [vmem:[#allocation54_spill] sm:$0xff] %v5507_v11  ;;  %v4154_v24 = vld [vmem:[%s6047_s3 + $0x40] sm:$0xff]  ;;  %1653 = vmatpush2.msra.mxu1 %v5507_v11 }
 0x23e   :  { %2031 = vmatprep.subr.mxu0 %v4151_v41  ;;  %v4155_v41 = vld [vmem:[%s6047_s3 + $0x38] sm:$0xff]  ;;  %1654 = vmatprep.subr.mxu1 %v6146_v8  ;;  %v4158_v11 = vld [vmem:[%s6047_s3 + $0x20] sm:$0xff] }
 0x23f   :  { %2032 = vmatpush1.msra.mxu0 %v4152_v58  ;;  %v4156_v58 = vld [vmem:[%s6047_s3 + $0x30] sm:$0xff] }
 0x240   :  { %2033 = vmatprep.subr.mxu0 %v4153_v52  ;;  %v5520_v52 = vld [vmem:[%s6049_s5 + $0x88] sm:$0xff] }
 0x241   :  { %2034 = vmatpush1.msra.mxu0 %v4154_v24  ;;  %6161 = vst [vmem:[#allocation55_spill] sm:$0xff] %v5520_v52  ;;  %1655 = vmatpush2.msra.mxu1 %v5520_v52  ;;  %v4157_v24 = vld [vmem:[%s6047_s3 + $0x28] sm:$0xff]  ;;  %v4160_v52 = vld [vmem:[%s6047_s3 + $0x10] sm:$0xff] }
 0x242   :  { %2035 = vmatprep.subr.mxu0 %v4155_v41  ;;  %1656 = vmatprep.subr.mxu1 %v6146_v8  ;;  %v5533_v41 = vld [vmem:[%s6049_s5 + $0x80] sm:$0xff] }
 0x243   :  { %2036 = vmatpush1.msra.mxu0 %v4156_v58  ;;  %6162 = vst [vmem:[#allocation56_spill] sm:$0xff] %v5533_v41  ;;  %1657 = vmatpush2.msra.mxu1 %v5533_v41  ;;  %v3496_v58 = vld [vmem:[%s6047_s3 + $0xf8] sm:$0xff]  ;;  %v4162_v41 = vld [vmem:[%s6047_s3] sm:$0xff] }
 0x244   :  { %2037 = vmatprep.subr.mxu0 %v4157_v24  ;;  %v4159_v24 = vld [vmem:[%s6047_s3 + $0x18] sm:$0xff]  ;;  %1956 = vmatprep.subr.mxu1 %v3496_v58  ;;  %v4165_v58 = vld [vmem:[%s6047_s3 + $0x168] sm:$0xff] }
 0x245   :  { %2038 = vmatpush1.msra.mxu0 %v4158_v11  ;;  %v4161_v11 = vld [vmem:[%s6047_s3 + $0x8] sm:$0xff] }
 0x246   :  { %2039 = vmatprep.subr.mxu0 %v4159_v24  ;;  %v4163_v24 = vld [vmem:[%s6047_s3 + $0x178] sm:$0xff] }
 0x247   :  { %2040 = vmatpush1.msra.mxu0 %v4160_v52  ;;  %v4164_v52 = vld [vmem:[%s6047_s3 + $0x170] sm:$0xff] }
 0x248   :  { %2041 = vmatprep.subr.mxu0 %v4161_v11  ;;  %v4167_v11 = vld [vmem:[%s6047_s3 + $0x158] sm:$0xff] }
 0x249   :  { %2042 = vmatpush1.msra.mxu0 %v4162_v41  ;;  %v4166_v41 = vld [vmem:[%s6047_s3 + $0x160] sm:$0xff] }
 0x24a   :  { %2196 = vmatprep.subr.mxu0 %v4163_v24  ;;  %3498 = vmatmul.mubr.msk.f32.vlgmr.msra.gmra.mxu0 %vm168_vm3, %v5441_v14  ;;  %v4168_v24 = vld [vmem:[%s6047_s3 + $0x150] sm:$0xff] }
 0x24b   :  { %2197 = vmatpush1.msra.mxu0 %v4164_v52  ;;  %2244 = vmatprep.mubr.f32.mxu0 %v6146_v8  ;;  %v4169_v52 = vld [vmem:[%s6047_s3 + $0x148] sm:$0xff] }
 0x24c   :  { %2198 = vmatprep.subr.mxu0 %v4165_v58  ;;  %v4170_v58 = vld [vmem:[%s6047_s3 + $0x140] sm:$0xff] }
 0x24d   :  { %2199 = vmatpush1.msra.mxu0 %v4166_v41  ;;  %v4171_v41 = vld [vmem:[%s6047_s3 + $0x138] sm:$0xff] }
 0x24e   :  { %2200 = vmatprep.subr.mxu0 %v4167_v11  ;;  %v4172_v11 = vld [vmem:[%s6047_s3 + $0x130] sm:$0xff] }
 0x24f   :  { %2201 = vmatpush1.msra.mxu0 %v4168_v24  ;;  %v2090_v24 = vrot.slane %v5441_v14, 2 }
 0x250   :  { %2202 = vmatprep.subr.mxu0 %v4169_v52  ;;  %v6197_v52 = vld [vmem:[#allocation39_spill] sm:$0xff] }
 0x251   :  { %2203 = vmatpush1.msra.mxu0 %v4170_v58  ;;  %v6198_v58 = vld [vmem:[#allocation40_spill] sm:$0xff] }
 0x252   :  { %2204 = vmatprep.subr.mxu0 %v4171_v41  ;;  %v6199_v41 = vld [vmem:[#allocation41_spill] sm:$0xff] }
 0x253   :  { %2205 = vmatpush1.msra.mxu0 %v4172_v11  ;;  %v6200_v11 = vld [vmem:[#allocation42_spill] sm:$0xff] }
 0x254   :  { %2206 = vmatprep.subr.mxu0 %v4569_v30  ;;  %v2261_v30 = vrot.slane %v5441_v14, 3 }
 0x255   :  { %2207 = vmatpush1.msra.mxu0 %v4575_v31  ;;  %v2432_v31 = vrot.slane %v5441_v14, 4 }
 0x256   :  { %2208 = vmatprep.subr.mxu0 %v4583_v34  ;;  %v6163_v34 = vld [vmem:[#allocation5_spill] sm:$0xff] }
 0x257   :  { %2209 = vmatpush1.msra.mxu0 %v4590_v35  ;;  %v6164_v35 = vld [vmem:[#allocation6_spill] sm:$0xff] }
 0x258   :  { %2210 = vmatprep.subr.mxu0 %v4599_v37  ;;  %v6165_v37 = vld [vmem:[#allocation7_spill] sm:$0xff] }
 0x259   :  { %2211 = vmatpush1.msra.mxu0 %v4606_v38  ;;  %v6166_v38 = vld [vmem:[#allocation8_spill] sm:$0xff] }
 0x25a   :  { %2367 = vmatprep.subr.mxu0 %v4617_v40  ;;  %3524 = vmatmul.mubr.msk.f32.vlgmr.msra.gmra.mxu0 %vm168_vm3, %v2090_v24  ;;  %v6167_v40 = vld [vmem:[#allocation9_spill] sm:$0xff] }
 0x25b   :  { %2368 = vmatpush1.msra.mxu0 %v4627_v42  ;;  %2415 = vmatprep.mubr.f32.mxu0 %v6146_v8  ;;  %v6168_v42 = vld [vmem:[#allocation10_spill] sm:$0xff] }
 0x25c   :  { %2369 = vmatprep.subr.mxu0 %v4639_v44  ;;  %v6169_v44 = vld [vmem:[#allocation11_spill] sm:$0xff] }
 0x25d   :  { %2370 = vmatpush1.msra.mxu0 %v4648_v45  ;;  %v6170_v45 = vld [vmem:[#allocation12_spill] sm:$0xff] }
 0x25e   :  { %2371 = vmatprep.subr.mxu0 %v4657_v47  ;;  %v6171_v47 = vld [vmem:[#allocation13_spill] sm:$0xff] }
 0x25f   :  { %2372 = vmatpush1.msra.mxu0 %v4664_v48  ;;  %v6172_v48 = vld [vmem:[#allocation14_spill] sm:$0xff] }
 0x260   :  { %2373 = vmatprep.subr.mxu0 %v4673_v50  ;;  %v6173_v50 = vld [vmem:[#allocation15_spill] sm:$0xff] }
 0x261   :  { %2374 = vmatpush1.msra.mxu0 %v4680_v51  ;;  %v6174_v51 = vld [vmem:[#allocation16_spill] sm:$0xff] }
 0x262   :  { %2375 = vmatprep.subr.mxu0 %v4689_v53  ;;  %v6175_v53 = vld [vmem:[#allocation17_spill] sm:$0xff] }
 0x263   :  { %2376 = vmatpush1.msra.mxu0 %v4696_v54  ;;  %v2603_v54 = vrot.slane %v5441_v14, 5 }
 0x264   :  { %2377 = vmatprep.subr.mxu0 %v4705_v56  ;;  %v6176_v56 = vld [vmem:[#allocation18_spill] sm:$0xff] }
 0x265   :  { %2378 = vmatpush1.msra.mxu0 %v4712_v57  ;;  %v6177_v57 = vld [vmem:[#allocation19_spill] sm:$0xff] }
 0x266   :  { %2379 = vmatprep.subr.mxu0 %v4721_v59  ;;  %v6178_v59 = vld [vmem:[#allocation20_spill] sm:$0xff] }
 0x267   :  { %2380 = vmatpush1.msra.mxu0 %v4728_v60  ;;  %v6179_v60 = vld [vmem:[#allocation21_spill] sm:$0xff] }
 0x268   :  { %2381 = vmatprep.subr.mxu0 %v4737_v62  ;;  %v6180_v62 = vld [vmem:[#allocation22_spill] sm:$0xff] }
 0x269   :  { %2382 = vmatpush1.msra.mxu0 %v4744_v63  ;;  %v6181_v63 = vld [vmem:[#allocation23_spill] sm:$0xff] }
 0x26a   :  { %2538 = vmatprep.subr.mxu0 %v4755_v2  ;;  %3550 = vmatmul.mubr.msk.f32.vlgmr.msra.gmra.mxu0 %vm168_vm3, %v2261_v30  ;;  %v6182_v2 = vld [vmem:[#allocation24_spill] sm:$0xff] }
 0x26b   :  { %2539 = vmatpush1.msra.mxu0 %v4765_v4  ;;  %2586 = vmatprep.mubr.f32.mxu0 %v6146_v8  ;;  %v6183_v4 = vld [vmem:[#allocation25_spill] sm:$0xff] }
 0x26c   :  { %2540 = vmatprep.subr.mxu0 %v4777_v6  ;;  %v6184_v6 = vld [vmem:[#allocation26_spill] sm:$0xff] }
 0x26d   :  { %2541 = vmatpush1.msra.mxu0 %v4786_v7  ;;  %v6185_v7 = vld [vmem:[#allocation27_spill] sm:$0xff] }
 0x26e   :  { %2542 = vmatprep.subr.mxu0 %v4795_v9  ;;  %v6186_v9 = vld [vmem:[#allocation28_spill] sm:$0xff] }
 0x26f   :  { %2543 = vmatpush1.msra.mxu0 %v4802_v10  ;;  %v6187_v10 = vld [vmem:[#allocation29_spill] sm:$0xff] }
 0x270   :  { %2544 = vmatprep.subr.mxu0 %v4811_v12  ;;  %v6188_v12 = vld [vmem:[#allocation30_spill] sm:$0xff] }
 0x271   :  { %2545 = vmatpush1.msra.mxu0 %v4818_v13  ;;  %v6189_v13 = vld [vmem:[#allocation31_spill] sm:$0xff] }
 0x272   :  { %2546 = vmatprep.subr.mxu0 %v4827_v16  ;;  %v6190_v16 = vld [vmem:[#allocation32_spill] sm:$0xff] }
 0x273   :  { %2547 = vmatpush1.msra.mxu0 %v4834_v17  ;;  %v6191_v17 = vld [vmem:[#allocation33_spill] sm:$0xff] }
 0x274   :  { %2548 = vmatprep.subr.mxu0 %v4843_v19  ;;  %v2774_v19 = vrot.slane %v5441_v14, 6 }
 0x275   :  { %2549 = vmatpush1.msra.mxu0 %v4850_v20  ;;  %v6192_v20 = vld [vmem:[#allocation34_spill] sm:$0xff] }
 0x276   :  { %2550 = vmatprep.subr.mxu0 %v4859_v22  ;;  %v6193_v22 = vld [vmem:[#allocation35_spill] sm:$0xff] }
 0x277   :  { %2551 = vmatpush1.msra.mxu0 %v4866_v23  ;;  %v6194_v23 = vld [vmem:[#allocation36_spill] sm:$0xff] }
 0x278   :  { %2552 = vmatprep.subr.mxu0 %v4875_v25  ;;  %v6195_v25 = vld [vmem:[#allocation37_spill] sm:$0xff] }
 0x279   :  { %2553 = vmatpush1.msra.mxu0 %v4882_v26  ;;  %v6196_v26 = vld [vmem:[#allocation38_spill] sm:$0xff] }
 0x27a   :  { %2709 = vmatprep.subr.mxu0 %v6163_v34  ;;  %3576 = vmatmul.mubr.msk.f32.vlgmr.msra.gmra.mxu0 %vm168_vm3, %v2432_v31  ;;  %v6201_v34 = vld [vmem:[#allocation43_spill] sm:$0xff] }
 0x27b   :  { %2710 = vmatpush1.msra.mxu0 %v6164_v35  ;;  %2757 = vmatprep.mubr.f32.mxu0 %v6146_v8  ;;  %v6202_v35 = vld [vmem:[#allocation44_spill] sm:$0xff] }
 0x27c   :  { %2711 = vmatprep.subr.mxu0 %v6165_v37  ;;  %v6203_v37 = vld [vmem:[#allocation45_spill] sm:$0xff] }
 0x27d   :  { %2712 = vmatpush1.msra.mxu0 %v6166_v38  ;;  %v6204_v38 = vld [vmem:[#allocation46_spill] sm:$0xff] }
 0x27e   :  { %2713 = vmatprep.subr.mxu0 %v6167_v40  ;;  %v6205_v40 = vld [vmem:[#allocation47_spill] sm:$0xff] }
 0x27f   :  { %2714 = vmatpush1.msra.mxu0 %v6168_v42  ;;  %v6206_v42 = vld [vmem:[#allocation48_spill] sm:$0xff] }
 0x280   :  { %2715 = vmatprep.subr.mxu0 %v6169_v44  ;;  %v6207_v44 = vld [vmem:[#allocation49_spill] sm:$0xff] }
 0x281   :  { %2716 = vmatpush1.msra.mxu0 %v6170_v45  ;;  %v2945_v45 = vrot.slane %v5441_v14, 7 }
 0x282   :  { %2717 = vmatprep.subr.mxu0 %v6171_v47  ;;  %v6208_v47 = vld [vmem:[#allocation50_spill] sm:$0xff] }
 0x283   :  { %2718 = vmatpush1.msra.mxu0 %v6172_v48  ;;  %v6209_v48 = vld [vmem:[#allocation51_spill] sm:$0xff] }
 0x284   :  { %2719 = vmatprep.subr.mxu0 %v6173_v50  ;;  %v6210_v50 = vld [vmem:[#allocation52_spill] sm:$0xff] }
 0x285   :  { %2720 = vmatpush1.msra.mxu0 %v6174_v51 }
 0x286   :  { %2721 = vmatprep.subr.mxu0 %v6175_v53 }
 0x287   :  { %2722 = vmatpush1.msra.mxu0 %v6176_v56 }
 0x288   :  { %2723 = vmatprep.subr.mxu0 %v6177_v57 }
 0x289   :  { %2724 = vmatpush1.msra.mxu0 %v6178_v59  ;;  %v3495_v59 = vld [vmem:[%s6047_s3 + $0xf0] sm:$0xff] }
 0x28a   :  { %2880 = vmatprep.subr.mxu0 %v6179_v60  ;;  %3602 = vmatmul.mubr.msk.f32.vlgmr.msra.gmra.mxu0 %vm168_vm3, %v2603_v54  ;;  %v3494_v60 = vld [vmem:[%s6047_s3 + $0xe8] sm:$0xff] }
 0x28b   :  { %2881 = vmatpush1.msra.mxu0 %v6180_v62  ;;  %2928 = vmatprep.mubr.f32.mxu0 %v6146_v8  ;;  %v3493_v62 = vld [vmem:[%s6047_s3 + $0xe0] sm:$0xff] }
 0x28c   :  { %2882 = vmatprep.subr.mxu0 %v6181_v63  ;;  %v3490_v63 = vld [vmem:[%s6047_s3 + $0xc8] sm:$0xff] }
 0x28d   :  { %2883 = vmatpush1.msra.mxu0 %v6182_v2  ;;  %v3489_v2 = vld [vmem:[%s6047_s3 + $0xc0] sm:$0xff] }
 0x28e   :  { %2884 = vmatprep.subr.mxu0 %v6183_v4  ;;  %v3488_v4 = vld [vmem:[%s6047_s3 + $0xb8] sm:$0xff] }
 0x28f   :  { %2885 = vmatpush1.msra.mxu0 %v6184_v6  ;;  %v3487_v6 = vld [vmem:[%s6047_s3 + $0xb0] sm:$0xff] }
 0x290   :  { %2886 = vmatprep.subr.mxu0 %v6185_v7  ;;  %v3486_v7 = vld [vmem:[%s6047_s3 + $0xa8] sm:$0xff] }
 0x291   :  { %2887 = vmatpush1.msra.mxu0 %v6186_v9  ;;  %v3485_v9 = vld [vmem:[%s6047_s3 + $0xa0] sm:$0xff] }
 0x292   :  { %2888 = vmatprep.subr.mxu0 %v6187_v10  ;;  %v3484_v10 = vld [vmem:[%s6047_s3 + $0x98] sm:$0xff] }
 0x293   :  { %2889 = vmatpush1.msra.mxu0 %v6188_v12  ;;  %v3483_v12 = vld [vmem:[%s6047_s3 + $0x90] sm:$0xff] }
 0x294   :  { %2890 = vmatprep.subr.mxu0 %v6189_v13  ;;  %v3482_v13 = vld [vmem:[%s6047_s3 + $0x88] sm:$0xff] }
 0x295   :  { %2891 = vmatpush1.msra.mxu0 %v6190_v16  ;;  %v3481_v16 = vld [vmem:[%s6047_s3 + $0x80] sm:$0xff] }
 0x296   :  { %2892 = vmatprep.subr.mxu0 %v6191_v17  ;;  %v3506_v17 = vld [vmem:[%s6046_s2 + $0xb8] sm:$0xff] }
 0x297   :  { %2893 = vmatpush1.msra.mxu0 %v6192_v20  ;;  %v6211_v20 = vrot.slane %v5441_v14, 1  ;;  %v6212_v14 = vld [vmem:[#allocation53_spill] sm:$0xff] }
 0x298   :  { %2894 = vmatprep.subr.mxu0 %v6193_v22  ;;  %v3505_v22 = vld [vmem:[%s6046_s2 + $0xb0] sm:$0xff] }
 0x299   :  { %2895 = vmatpush1.msra.mxu0 %v6194_v23  ;;  %v3504_v23 = vld [vmem:[%s6046_s2 + $0xa8] sm:$0xff] }
 0x29a   :  { %3051 = vmatprep.subr.mxu0 %v6195_v25  ;;  %3628 = vmatmul.mubr.msk.f32.vlgmr.msra.gmra.mxu0 %vm168_vm3, %v2774_v19  ;;  %v3503_v25 = vld [vmem:[%s6046_s2 + $0xa0] sm:$0xff] }
 0x29b   :  { %3052 = vmatpush1.msra.mxu0 %v6196_v26  ;;  %3099 = vmatprep.mubr.f32.mxu0 %v6146_v8  ;;  %v3502_v26 = vld [vmem:[%s6046_s2 + $0x98] sm:$0xff] }
 0x29c   :  { %3053 = vmatprep.subr.mxu0 %v6197_v52  ;;  %v3501_v52 = vld [vmem:[%s6046_s2 + $0x90] sm:$0xff] }
 0x29d   :  { %3054 = vmatpush1.msra.mxu0 %v6198_v58  ;;  %v3500_v58 = vld [vmem:[%s6046_s2 + $0x88] sm:$0xff] }
 0x29e   :  { %3055 = vmatprep.subr.mxu0 %v6199_v41  ;;  %v3499_v41 = vld [vmem:[%s6046_s2 + $0x80] sm:$0xff] }
 0x29f   :  { %3056 = vmatpush1.msra.mxu0 %v6200_v11  ;;  %v3532_v11 = vld [vmem:[%s6046_s2 + $0xf8] sm:$0xff] }
 0x2a0   :  { %3057 = vmatprep.subr.mxu0 %v6201_v34  ;;  %v3531_v34 = vld [vmem:[%s6046_s2 + $0xf0] sm:$0xff] }
 0x2a1   :  { %3058 = vmatpush1.msra.mxu0 %v6202_v35  ;;  %v3530_v35 = vld [vmem:[%s6046_s2 + $0xe8] sm:$0xff] }
 0x2a2   :  { %3059 = vmatprep.subr.mxu0 %v6203_v37 }
 0x2a3   :  { %3060 = vmatpush1.msra.mxu0 %v6204_v38 }
 0x2a4   :  { %3061 = vmatprep.subr.mxu0 %v6205_v40  ;;  %v3528_v40 = vld [vmem:[%s6046_s2 + $0xd8] sm:$0xff] }
 0x2a5   :  { %3062 = vmatpush1.msra.mxu0 %v6206_v42  ;;  %v3527_v42 = vld [vmem:[%s6046_s2 + $0xd0] sm:$0xff] }
 0x2a6   :  { %3063 = vmatprep.subr.mxu0 %v6207_v44  ;;  %v3526_v44 = vld [vmem:[%s6046_s2 + $0xc8] sm:$0xff] }
 0x2a7   :  { %3064 = vmatpush1.msra.mxu0 %v6208_v47  ;;  %v3525_v47 = vld [vmem:[%s6046_s2 + $0xc0] sm:$0xff] }
 0x2a8   :  { %3065 = vmatprep.subr.mxu0 %v6209_v48  ;;  %v3558_v48 = vld [vmem:[%s6046_s2 + $0x138] sm:$0xff] }
 0x2a9   :  { %3066 = vmatpush1.msra.mxu0 %v6210_v50  ;;  %v3557_v50 = vld [vmem:[%s6046_s2 + $0x130] sm:$0xff] }
 0x2aa   :  { %3654 = vmatmul.mubr.msk.f32.vlgmr.msra.gmra.mxu0 %vm168_vm3, %v2945_v45 }
 0x2c1   :  { %v1583_v51 = vpop.f32.mrf.mxu1 }
 0x2c2   :  { %v1588_v57 = vmul.f32 %v1583_v51, %v5419_v5  ;;  %v3492_v5 = vld [vmem:[%s6047_s3 + $0xd8] sm:$0xff]  ;;  %v3556_v51 = vld [vmem:[%s6046_s2 + $0x128] sm:$0xff] }
 0x2c3   :  { %v1585_v53 = vpop.f32.mrf.mxu1 }
 0x2c4   :  { %v1589_v56 = vmul.f32 %v1585_v53, %v5428_v55  ;;  %v3491_v55 = vld [vmem:[%s6047_s3 + $0xd0] sm:$0xff] }
 0x2c6   :  { %3463 = vmatprep.mubr.msk.f32.mxu1 %vm1590_vm6, %v1589_v56 }
 0x2c7   :  { %1659 = vmatmul.mubr.f32.vlgmr.msra.gmra.mxu1 %v1588_v57 }
 0x2c8   :  { %1957 = vmatpush1.msra.mxu1 %v3495_v59  ;;  %2004 = vmatprep.mubr.f32.mxu1 %v6146_v8  ;;  %v3554_v59 = vld [vmem:[%s6046_s2 + $0x118] sm:$0xff] }
 0x2c9   :  { %1958 = vmatprep.subr.mxu1 %v3494_v60  ;;  %v3553_v60 = vld [vmem:[%s6046_s2 + $0x110] sm:$0xff] }
 0x2ca   :  { %1959 = vmatpush1.msra.mxu1 %v3493_v62  ;;  %v3552_v62 = vld [vmem:[%s6046_s2 + $0x108] sm:$0xff] }
 0x2cb   :  { %1960 = vmatprep.subr.mxu1 %v3492_v5  ;;  %v3551_v5 = vld [vmem:[%s6046_s2 + $0x100] sm:$0xff] }
 0x2cc   :  { %1961 = vmatpush1.msra.mxu1 %v3491_v55  ;;  %v3584_v55 = vld [vmem:[%s6046_s2 + $0x178] sm:$0xff] }
 0x2cd   :  { %1962 = vmatprep.subr.mxu1 %v3490_v63  ;;  %v3583_v63 = vld [vmem:[%s6046_s2 + $0x170] sm:$0xff] }
 0x2ce   :  { %1963 = vmatpush1.msra.mxu1 %v3489_v2  ;;  %v3582_v2 = vld [vmem:[%s6046_s2 + $0x168] sm:$0xff] }
 0x2cf   :  { %1964 = vmatprep.subr.mxu1 %v3488_v4  ;;  %v3580_v4 = vld [vmem:[%s6046_s2 + $0x158] sm:$0xff] }
 0x2d0   :  { %1965 = vmatpush1.msra.mxu1 %v3487_v6  ;;  %v3579_v6 = vld [vmem:[%s6046_s2 + $0x150] sm:$0xff] }
 0x2d1   :  { %1966 = vmatprep.subr.mxu1 %v3486_v7  ;;  %v3578_v7 = vld [vmem:[%s6046_s2 + $0x148] sm:$0xff] }
 0x2d2   :  { %1967 = vmatpush1.msra.mxu1 %v3485_v9  ;;  %v3577_v9 = vld [vmem:[%s6046_s2 + $0x140] sm:$0xff] }
 0x2d3   :  { %1968 = vmatprep.subr.mxu1 %v3484_v10  ;;  %v3610_v10 = vld [vmem:[%s6046_s2 + $0x1b8] sm:$0xff] }
 0x2d4   :  { %1969 = vmatpush1.msra.mxu1 %v3483_v12  ;;  %v3609_v12 = vld [vmem:[%s6046_s2 + $0x1b0] sm:$0xff] }
 0x2d5   :  { %1970 = vmatprep.subr.mxu1 %v3482_v13  ;;  %v3608_v13 = vld [vmem:[%s6046_s2 + $0x1a8] sm:$0xff] }
 0x2d6   :  { %1971 = vmatpush1.msra.mxu1 %v3481_v16  ;;  %v3606_v16 = vld [vmem:[%s6046_s2 + $0x198] sm:$0xff] }
 0x2d7   :  { %3497 = vmatmul.mubr.msk.f32.vlgmr.msra.gmra.mxu1 %vm168_vm3, %v6211_v20  ;;  %4030 = vmatprep.subr.mxu1 %v6146_v8  ;;  %v3604_v20 = vld [vmem:[%s6046_s2 + $0x188] sm:$0xff] }
 0x2d8   :  { %4031 = vmatpush3.msra.mxu1 %v3506_v17  ;;  %4046 = vmatprep.mubr.msk.f32.mxu1 %vm4199_vm1, %v6146_v8  ;;  %v3605_v17 = vld [vmem:[%s6046_s2 + $0x190] sm:$0xff] }
 0x2d9   :  { %4032 = vmatprep.subr.mxu1 %v6146_v8 }
 0x2da   :  { %4033 = vmatpush3.msra.mxu1 %v3505_v22  ;;  %v3603_v22 = vld [vmem:[%s6046_s2 + $0x180] sm:$0xff] }
 0x2db   :  { %4034 = vmatprep.subr.mxu1 %v6146_v8 }
 0x2dc   :  { %4035 = vmatpush3.msra.mxu1 %v3504_v23  ;;  %v3636_v23 = vld [vmem:[%s6046_s2 + $0x1f8] sm:$0xff] }
 0x2dd   :  { %4036 = vmatprep.subr.mxu1 %v6146_v8 }
 0x2de   :  { %4037 = vmatpush3.msra.mxu1 %v3503_v25  ;;  %v3635_v25 = vld [vmem:[%s6046_s2 + $0x1f0] sm:$0xff] }
 0x2df   :  { %4038 = vmatprep.subr.mxu1 %v6146_v8 }
 0x2e0   :  { %4039 = vmatpush3.msra.mxu1 %v3502_v26  ;;  %v3634_v26 = vld [vmem:[%s6046_s2 + $0x1e8] sm:$0xff] }
 0x2e1   :  { %4040 = vmatprep.subr.mxu1 %v6146_v8 }
 0x2e2   :  { %4041 = vmatpush3.msra.mxu1 %v3501_v52  ;;  %v3632_v52 = vld [vmem:[%s6046_s2 + $0x1d8] sm:$0xff] }
 0x2e3   :  { %4042 = vmatprep.subr.mxu1 %v6146_v8 }
 0x2e4   :  { %4043 = vmatpush3.msra.mxu1 %v3500_v58  ;;  %v3631_v58 = vld [vmem:[%s6046_s2 + $0x1d0] sm:$0xff] }
 0x2e5   :  { %4044 = vmatprep.subr.mxu1 %v6146_v8 }
 0x2e6   :  { %4045 = vmatpush3.msra.mxu1 %v3499_v41  ;;  %v3630_v41 = vld [vmem:[%s6046_s2 + $0x1c8] sm:$0xff] }
 0x2e7   :  { %4047 = vmatmul.mubr.msk.f32.vlgmr.msra.gmra.mxu1 %vm168_vm3, %v2090_v24  ;;  %4049 = vmatprep.subr.mxu1 %v6146_v8  ;;  %v3529_v24 = vld [vmem:[%s6046_s2 + $0xe0] sm:$0xff] }
 0x2e8   :  { %4050 = vmatpush3.msra.mxu1 %v3532_v11  ;;  %4065 = vmatprep.mubr.msk.f32.mxu1 %vm4199_vm1, %v6146_v8  ;;  %v3629_v11 = vld [vmem:[%s6046_s2 + $0x1c0] sm:$0xff] }
 0x2e9   :  { %4051 = vmatprep.subr.mxu1 %v6146_v8 }
 0x2ea   :  { %4052 = vmatpush3.msra.mxu1 %v3531_v34  ;;  %v1848_v37 = vpop.f32.mrf.mxu0  ;;  %v4173_v34 = vld [vmem:[%s6048_s4 + $0x18] sm:$0xff] }
 0x2eb   :  { %4053 = vmatprep.subr.mxu1 %v6146_v8 }
 0x2ec   :  { %4054 = vmatpush3.msra.mxu1 %v3530_v35  ;;  %v4010_v38 = vpop.f32.mrf.mxu0  ;;  %v4174_v35 = vld [vmem:[%s6048_s4 + $0x10] sm:$0xff] }
 0x2ed   :  { %4055 = vmatprep.subr.mxu1 %v6146_v8 }
 0x2ee   :  { %4056 = vmatpush3.msra.mxu1 %v3529_v24 }
 0x2ef   :  { %4057 = vmatprep.subr.mxu1 %v6146_v8 }
 0x2f0   :  { %4058 = vmatpush3.msra.mxu1 %v3528_v40 }
 0x2f1   :  { %4059 = vmatprep.subr.mxu1 %v6146_v8 }
 0x2f2   :  { %4060 = vmatpush3.msra.mxu1 %v3527_v42 }
 0x2f3   :  { %4061 = vmatprep.subr.mxu1 %v6146_v8 }
 0x2f4   :  { %4062 = vmatpush3.msra.mxu1 %v3526_v44 }
 0x2f5   :  { %4063 = vmatprep.subr.mxu1 %v6146_v8 }
 0x2f6   :  { %4064 = vmatpush3.msra.mxu1 %v3525_v47 }
 0x2f7   :  { %4066 = vmatmul.mubr.msk.f32.vlgmr.msra.gmra.mxu1 %vm168_vm3, %v2261_v30  ;;  %4068 = vmatprep.subr.mxu1 %v6146_v8  ;;  %v3555_v30 = vld [vmem:[%s6046_s2 + $0x120] sm:$0xff] }
 0x2f8   :  { %4069 = vmatpush3.msra.mxu1 %v3558_v48  ;;  %4084 = vmatprep.mubr.msk.f32.mxu1 %vm4199_vm1, %v6146_v8 }
 0x2f9   :  { %4070 = vmatprep.subr.mxu1 %v6146_v8 }
 0x2fa   :  { %4071 = vmatpush3.msra.mxu1 %v3557_v50  ;;  %v1920_v53 = vpop.f32.mrf.mxu0 }
 0x2fb   :  { %4072 = vmatprep.subr.mxu1 %v6146_v8  ;;  %v5845_v56 = vadd.f32 %v1920_v53, %v1848_v37  ;;  %v4175_v37 = vld [vmem:[%s6048_s4 + $0x8] sm:$0xff]  ;;  %s4200_s4 = smov [#allocation2]  }
 0x2fc   :  { %4073 = vmatpush3.msra.mxu1 %v3556_v51  ;;  %v4029_v57 = vpop.f32.mrf.mxu0  ;;  %s3267_s23 = sshll.u32 %s4200_s4, 4  ;;  %s3268_s23 = int_to_ptr.vmem [resolvable:$true] %s3267_s23 }
 0x2fd   :  { %4074 = vmatprep.subr.mxu1 %v6146_v8  ;;  %s4176_s24 = scalar_lea.vmem %s3268_s23, 32  ;;  %p4181_p1 = scmp.lt.s32.totalorder %s3268_s23, %s3268_s23 }
 0x2fe   :  { %4075 = vmatpush3.msra.mxu1 %v3555_v30  ;;  %p4177_p0 = scmp.ne.s32.totalorder %s3268_s23, %s4176_s24  ;;  %p4182_p2 = scmp.lt.s32.totalorder %s4176_s24, %s4176_s24 }
 0x2ff   :  { %4076 = vmatprep.subr.mxu1 %v6146_v8 }
 0x300   :  { %4077 = vmatpush3.msra.mxu1 %v3554_v59  ;;  %p4183_p3 = por %p4182_p2, %p4181_p1 }
 0x301   :  { %4078 = vmatprep.subr.mxu1 %v6146_v8 }
 0x302   :  { %4079 = vmatpush3.msra.mxu1 %v3553_v60  ;;  %p4184_p4 = pnand %p4183_p3, %p4177_p0 }
 0x303   :  { %4080 = vmatprep.subr.mxu1 %v6146_v8 }
 0x304   :  { %4081 = vmatpush3.msra.mxu1 %v3552_v62 }
 0x305   :  { %4082 = vmatprep.subr.mxu1 %v6146_v8 }
 0x306   :  { %4083 = vmatpush3.msra.mxu1 %v3551_v5 }
 0x307   :  { %4085 = vmatmul.mubr.msk.f32.vlgmr.msra.gmra.mxu1 %vm168_vm3, %v2432_v31  ;;  %4087 = vmatprep.subr.mxu1 %v6146_v8  ;;  %v3581_v31 = vld [vmem:[%s6046_s2 + $0x160] sm:$0xff] }
 0x308   :  { %4088 = vmatpush3.msra.mxu1 %v3584_v55  ;;  %4103 = vmatprep.mubr.msk.f32.mxu1 %vm4199_vm1, %v6146_v8 }
 0x309   :  { %4089 = vmatprep.subr.mxu1 %v6146_v8 }
 0x30a   :  { %4090 = vmatpush3.msra.mxu1 %v3583_v63 }
 0x30b   :  { %4091 = vmatprep.subr.mxu1 %v6146_v8 }
 0x30c   :  { %4092 = vmatpush3.msra.mxu1 %v3582_v2 }
 0x30d   :  { %4093 = vmatprep.subr.mxu1 %v6146_v8 }
 0x30e   :  { %4094 = vmatpush3.msra.mxu1 %v3581_v31 }
 0x30f   :  { %4095 = vmatprep.subr.mxu1 %v6146_v8 }
 0x310   :  { %4096 = vmatpush3.msra.mxu1 %v3580_v4 }
 0x311   :  { %4097 = vmatprep.subr.mxu1 %v6146_v8 }
 0x312   :  { %4098 = vmatpush3.msra.mxu1 %v3579_v6 }
 0x313   :  { %4099 = vmatprep.subr.mxu1 %v6146_v8 }
 0x314   :  { %4100 = vmatpush3.msra.mxu1 %v3578_v7 }
 0x315   :  { %4101 = vmatprep.subr.mxu1 %v6146_v8 }
 0x316   :  { %4102 = vmatpush3.msra.mxu1 %v3577_v9 }
 0x317   :  { %4104 = vmatmul.mubr.msk.f32.vlgmr.msra.gmra.mxu1 %vm168_vm3, %v2603_v54  ;;  %4106 = vmatprep.subr.mxu1 %v6146_v8  ;;  %v3607_v54 = vld [vmem:[%s6046_s2 + $0x1a0] sm:$0xff] }
 0x318   :  { %4107 = vmatpush3.msra.mxu1 %v3610_v10  ;;  %4122 = vmatprep.mubr.msk.f32.mxu1 %vm4199_vm1, %v6146_v8 }
 0x319   :  { %4108 = vmatprep.subr.mxu1 %v6146_v8 }
 0x31a   :  { %4109 = vmatpush3.msra.mxu1 %v3609_v12 }
 0x31b   :  { %4110 = vmatprep.subr.mxu1 %v6146_v8 }
 0x31c   :  { %4111 = vmatpush3.msra.mxu1 %v3608_v13 }
 0x31d   :  { %4112 = vmatprep.subr.mxu1 %v6146_v8 }
 0x31e   :  { %4113 = vmatpush3.msra.mxu1 %v3607_v54 }
 0x31f   :  { %4114 = vmatprep.subr.mxu1 %v6146_v8 }
 0x320   :  { %4115 = vmatpush3.msra.mxu1 %v3606_v16 }
 0x321   :  { %4116 = vmatprep.subr.mxu1 %v6146_v8 }
 0x322   :  { %4117 = vmatpush3.msra.mxu1 %v3605_v17 }
 0x323   :  { %4118 = vmatprep.subr.mxu1 %v6146_v8 }
 0x324   :  { %4119 = vmatpush3.msra.mxu1 %v3604_v20 }
 0x325   :  { %4120 = vmatprep.subr.mxu1 %v6146_v8 }
 0x326   :  { %4121 = vmatpush3.msra.mxu1 %v3603_v22 }
 0x327   :  { %4123 = vmatmul.mubr.msk.f32.vlgmr.msra.gmra.mxu1 %vm168_vm3, %v2774_v19  ;;  %4125 = vmatprep.subr.mxu1 %v6146_v8  ;;  %v3633_v19 = vld [vmem:[%s6046_s2 + $0x1e0] sm:$0xff] }
 0x328   :  { %4126 = vmatpush3.msra.mxu1 %v3636_v23  ;;  %4141 = vmatprep.mubr.msk.f32.mxu1 %vm4199_vm1, %v6146_v8 }
 0x329   :  { %4127 = vmatprep.subr.mxu1 %v6146_v8 }
 0x32a   :  { %4128 = vmatpush3.msra.mxu1 %v3635_v25 }
 0x32b   :  { %4129 = vmatprep.subr.mxu1 %v6146_v8 }
 0x32c   :  { %4130 = vmatpush3.msra.mxu1 %v3634_v26 }
 0x32d   :  { %4131 = vmatprep.subr.mxu1 %v6146_v8 }
 0x32e   :  { %4132 = vmatpush3.msra.mxu1 %v3633_v19 }
 0x32f   :  { %4133 = vmatprep.subr.mxu1 %v6146_v8 }
 0x330   :  { %4134 = vmatpush3.msra.mxu1 %v3632_v52 }
 0x331   :  { %4135 = vmatprep.subr.mxu1 %v6146_v8 }
 0x332   :  { %4136 = vmatpush3.msra.mxu1 %v3631_v58 }
 0x333   :  { %4137 = vmatprep.subr.mxu1 %v6146_v8 }
 0x334   :  { %4138 = vmatpush3.msra.mxu1 %v3630_v41 }
 0x335   :  { %4139 = vmatprep.subr.mxu1 %v6146_v8 }
 0x336   :  { %4140 = vmatpush3.msra.mxu1 %v3629_v11 }
 0x337   :  { %4142 = vmatmul.mubr.msk.f32.vlgmr.msra.gmra.mxu1 %vm168_vm3, %v2945_v45  ;;  %3142 = vmatprep.subr.mxu1 %v4173_v34 }
 0x338   :  { %3143 = vmatpush1.msra.mxu1 %v4174_v35  ;;  %3178 = vmatprep.mubr.f32.mxu1 %v6146_v8 }
 0x339   :  { %3144 = vmatprep.subr.mxu1 %v4175_v37 }
 0x33a   :  { %3145 = vmatpush1.msra.mxu1 %v6212_v14 }
 0x33b   :  { %3190 = vmatprep.subr.mxu1 %v6146_v8 }
 0x387   :  { %v1660_v45 = vpop.f32.mrf.mxu1 }
 0x388   :  { %1665 = vst.msk [vmem:[#allocation2] sm:$0x1] %vm1664_vm7, %v1660_v45 }
 0x389   :  { %v1662_v24 = vpop.f32.mrf.mxu1 }
 0x397   :  { %v5991_v38 = vpop.f32.mrf.mxu1 }
 0x399   :  { %v5993_v40 = vpop.f32.mrf.mxu1 }
 0x3a7   :  { %v2159_v42 = vpop.f32.mrf.mxu1 }
 0x3a8   :  { %v2163_v44 = vadd.f32 %v2159_v42, %v5845_v56 }
 0x3a9   :  { %v4048_v47 = vpop.f32.mrf.mxu1 }
 0x3b7   :  { %v2330_v48 = vpop.f32.mrf.mxu1 }
 0x3b8   :  { %v2334_v62 = vadd.f32 %v2330_v48, %v2163_v44 }
 0x3b9   :  { %v4067_v50 = vpop.f32.mrf.mxu1 }
 0x3c7   :  { %v2501_v51 = vpop.f32.mrf.mxu1 }
 0x3c8   :  { %v2505_v5 = vadd.f32 %v2501_v51, %v2334_v62 }
 0x3c9   :  { %v4086_v53 = vpop.f32.mrf.mxu1 }
 0x3d7   :  { %v2672_v30 = vpop.f32.mrf.mxu1 }
 0x3d8   :  { %v2676_v55 = vadd.f32 %v2672_v30, %v2505_v5 }
 0x3d9   :  { %v4105_v57 = vpop.f32.mrf.mxu1 }
 0x3e7   :  { %v2843_v59 = vpop.f32.mrf.mxu1 }
 0x3e8   :  { %v2847_v63 = vadd.f32 %v2843_v59, %v2676_v55 }
 0x3e9   :  { %v4124_v60 = vpop.f32.mrf.mxu1 }
 0x3f7   :  { %v3014_v2 = vpop.f32.mrf.mxu1 }
 0x3f8   :  { %v3018_v31 = vadd.f32 %v3014_v2, %v2847_v63 }
 0x3f9   :  { %v4143_v4 = vpop.f32.mrf.mxu1 }
 0x3fa   :  { %vm3108_vm8 = vcmp.ge.f32.partialorder %v3018_v31, 0.0 }
 0x3fb   :  { %v3655_v6 = vsel %vm3108_vm8, 1.0, %v6146_v8 }
 0x3fc   :  { %3656 = vmatmul.mubr.msk.f32.vlgmr.msra.gmra.mxu1 %vm1513_vm4, %v3655_v6 }
 0x3fd   :  { %3191 = vmatpush1.msra.mxu1 %v5319_v39  ;;  %v6213_v39 = vld [vmem:[#allocation54_spill] sm:$0xff] }
 0x3fe   :  { %3192 = vmatprep.subr.mxu1 %v6146_v8 }
 0x3ff   :  { %3193 = vmatpush1.msra.mxu1 %v5326_v33  ;;  %v6214_v33 = vld [vmem:[#allocation55_spill] sm:$0xff] }
 0x400   :  { %3194 = vmatprep.subr.mxu1 %v6146_v8 }
 0x401   :  { %3195 = vmatpush1.msra.mxu1 %v5333_v28  ;;  %v6215_v28 = vld [vmem:[#allocation56_spill] sm:$0xff] }
 0x402   :  { %3196 = vmatprep.subr.mxu1 %v6146_v8 }
 0x403   :  { %3197 = vmatpush1.msra.mxu1 %v5340_v46  ;;  %v2077_v46 = vpop.f32.mrf.mxu0 }
 0x404   :  { %3198 = vmatprep.subr.mxu1 %v6146_v8 }
 0x405   :  { %3199 = vmatpush1.msra.mxu1 %v5347_v49  ;;  %v2079_v49 = vpop.f32.mrf.mxu0 }
 0x406   :  { %3200 = vmatprep.subr.mxu1 %v6146_v8 }
 0x407   :  { %3201 = vmatpush1.msra.mxu1 %v5354_v0  ;;  %v2246_v0 = vpop.f32.mrf.mxu0 }
 0x408   :  { %3202 = vmatprep.subr.mxu1 %v6146_v8 }
 0x409   :  { %3203 = vmatpush1.msra.mxu1 %v5361_v15  ;;  %v2248_v15 = vpop.f32.mrf.mxu0 }
 0x40a   :  { %3204 = vmatprep.subr.mxu1 %v6146_v8 }
 0x40b   :  { %3205 = vmatpush1.msra.mxu1 %v5368_v36  ;;  %v2417_v36 = vpop.f32.mrf.mxu0 }
 0x40c   :  { %3206 = vmatprep.subr.mxu1 %v6146_v8 }
 0x40d   :  { %3207 = vmatpush1.msra.mxu1 %v5375_v21  ;;  %v2419_v21 = vpop.f32.mrf.mxu0 }
 0x40e   :  { %3208 = vmatprep.subr.mxu1 %v6146_v8 }
 0x40f   :  { %3209 = vmatpush1.msra.mxu1 %v5382_v3  ;;  %v2588_v3 = vpop.f32.mrf.mxu0 }
 0x410   :  { %3210 = vmatprep.subr.mxu1 %v6146_v8 }
 0x411   :  { %3211 = vmatpush1.msra.mxu1 %v5389_v61  ;;  %v2590_v61 = vpop.f32.mrf.mxu0 }
 0x412   :  { %3212 = vmatprep.subr.mxu1 %v6146_v8 }
 0x413   :  { %3213 = vmatpush1.msra.mxu1 %v5396_v18  ;;  %v2080_v18 = vadd.f32 %v2079_v49, %v5993_v40 }
 0x414   :  { %3214 = vmatprep.subr.mxu1 %v6146_v8 }
 0x415   :  { %3215 = vmatpush1.msra.mxu1 %v5403_v1  ;;  %v2078_v1 = vadd.f32 %v2077_v46, %v5991_v38 }
 0x416   :  { %3216 = vmatprep.subr.mxu1 %v6146_v8 }
 0x417   :  { %3217 = vmatpush1.msra.mxu1 %v5410_v32  ;;  %v2759_v32 = vpop.f32.mrf.mxu0 }
 0x418   :  { %3218 = vmatprep.subr.mxu1 %v6146_v8 }
 0x419   :  { %3219 = vmatpush1.msra.mxu1 %v5417_v29  ;;  %v2252_v29 = vadd.f32 %v2248_v15, %v2080_v18 }
 0x41a   :  { %3220 = vmatprep.subr.mxu1 %v6146_v8 }
 0x41b   :  { %3221 = vmatpush1.msra.mxu1 %v5426_v27  ;;  %v2251_v27 = vadd.f32 %v2246_v0, %v2078_v1  ;;  %v2423_v56 = vadd.f32 %v2419_v21, %v2252_v29 }
 0x41c   :  { %3246 = vmatprep.subr.mxu1 %v6146_v8 }
 0x41d   :  { %3247 = vmatpush2.msra.mxu1 %v5435_v43  ;;  %v2761_v43 = vpop.f32.mrf.mxu0  ;;  %v2594_v9 = vadd.f32 %v2590_v61, %v2423_v56 }
 0x41e   :  { %3248 = vmatprep.subr.mxu1 %v6146_v8 }
 0x41f   :  { %3249 = vmatpush2.msra.mxu1 %v6213_v39  ;;  %v2930_v7 = vpop.f32.mrf.mxu0  ;;  %v2765_v13 = vadd.f32 %v2761_v43, %v2594_v9 }
 0x420   :  { %3250 = vmatprep.subr.mxu1 %v6146_v8 }
 0x421   :  { %3251 = vmatpush2.msra.mxu1 %v6214_v33  ;;  %v2932_v12 = vpop.f32.mrf.mxu0 }
 0x422   :  { %3252 = vmatprep.subr.mxu1 %v6146_v8  ;;  %v2422_v8 = vadd.f32 %v2417_v36, %v2251_v27  ;;  %v2936_v17 = vadd.f32 %v2932_v12, %v2765_v13 }
 0x423   :  { %3253 = vmatpush2.msra.mxu1 %v6215_v28  ;;  %v3101_v16 = vpop.f32.mrf.mxu0 }
 0x424   :  { %v2593_v10 = vadd.f32 %v2588_v3, %v2422_v8 }
 0x425   :  { %v3103_v22 = vpop.f32.mrf.mxu0 }
 0x426   :  { %v2764_v54 = vadd.f32 %v2759_v32, %v2593_v10  ;;  %v3107_v25 = vadd.f32 %v3103_v22, %v2936_v17 }
 0x428   :  { %v2935_v20 = vadd.f32 %v2930_v7, %v2764_v54 }
 0x42a   :  { %v3106_v26 = vadd.f32 %v3101_v16, %v2935_v20 }
 0x4bc   :  { %v3180_v23 = vpop.f32.mrf.mxu1 }
 0x4bd   :  { %v3185_v58 = vmul.f32 %v3180_v23, %v3106_v26 }
 0x4be   :  { %v3182_v19 = vpop.f32.mrf.mxu1 }
 0x4bf   :  { %v3186_v52 = vmul.f32 %v3182_v19, %v3107_v25 }
 0x4c1   :  { %3657 = vmatprep.mubr.msk.f32.mxu1 %vm1590_vm6, %v3186_v52 }
 0x4c2   :  { %3255 = vmatmul.mubr.f32.vlgmr.msra.gmra.mxu1 %v3185_v58 }
 0x582   :  { %v3256_v41 = vpop.f32.mrf.mxu1 }
 0x583   :  { %3260 = vst.msk [vmem:[#allocation2 + $0x1] sm:$0x1] %vm1664_vm7, %v3256_v41 }
 0x584   :  { %v3258_v11 = vpop.f32.mrf.mxu1 }
 0x585   :  { %4187 = shalt.err (!%p4184_p4)
}
 0x586   :  { %3270 = dma.vmem_to_hbm [thread:$0]  %s3268_s23, 32, %s6050_s6, [#allocation3]  }
 0x587   :  { %4196 = dma.done.wait [#allocation3], 32  }
 0x588   :  { %4197 = vsyncadd [#allocation3], 4294967264 }
 0x589   :  { %3274 = vsyncpa [#allocation3], 1 }

</bundles_post_ra>
